<compile_context>
chip_gen: v5e
topology: v5e:2x2
jax: 0.10.0
libtpu: 0.0.40
codegen_flags: <defaults>
</compile_context>

<pallas_src>
import functools

import jax
import jax.numpy as jnp
from jax import lax
from jax.experimental import pallas as pl
from jax.experimental.pallas import tpu as pltpu


# ----------------------------------------------------------------------------
# Activation helper (mirrors build_activation for the common cases)
# ----------------------------------------------------------------------------
def _apply_act(y, act):
    if act is None or act == "none":
        return y
    if act == "relu":
        return jnp.maximum(y, 0.0)
    if act == "relu6":
        return jnp.clip(y, 0.0, 6.0)
    if act == "h_swish":
        return y * jnp.clip(y + 3.0, 0.0, 6.0) * (1.0 / 6.0)
    if act == "h_sigmoid":
        return jnp.clip(y + 3.0, 0.0, 6.0) * (1.0 / 6.0)
    if act == "tanh":
        return jnp.tanh(y)
    if act == "sigmoid":
        return 1.0 / (1.0 + jnp.exp(-y))
    raise ValueError("unsupported act_func: %s" % act)


# ----------------------------------------------------------------------------
# Fused kernel: one batch element per grid step, channel-major layout.
#   x_ref    : (1, Cin_p, S)
#   w_ib_ref : (Cf, Cin_p)    expand weights, BN scale folded in
#   b_ib_ref : (Cf, 1)        expand BN shift
#   w_dw_ref : (K^3, Cf, 1)   depthwise tap weights, BN scale folded in
#   b_dw_ref : (Cf, 1)        depthwise BN shift
#   mask_ref : (K^3, 1, S)    per-tap zero-padding boundary masks (0/1 f32)
#   w_pl_ref : (Cout, Cf)     project weights, BN scale folded in
#   b_pl_ref : (Cout, 1)      project BN shift
#   o_ref    : (1, Cout, S)
# ----------------------------------------------------------------------------
def _mbconv_fused_kernel(x_ref, w_ib_ref, b_ib_ref, w_dw_ref, b_dw_ref,
                         mask_ref, w_pl_ref, b_pl_ref, o_ref, *,
                         shifts, ib_act, act):
    x = x_ref[0]                                            # (Cin_p, S)

    # ---- stage 1: 1x1x1 expand conv (MXU) + BN shift + act ------------------
    y = jnp.dot(w_ib_ref[...], x, preferred_element_type=jnp.float32)
    y = _apply_act(y + b_ib_ref[...], ib_act)               # (Cf, S)

    # ---- stage 2: KxKxK depthwise conv via lane rolls + boundary masks ------
    # tap t wants y[:, s + off_t] (zero outside the volume); pltpu.roll with
    # shift = (-off_t) % S gives the circular shift, the precomputed mask
    # zeroes the wrapped-around lanes -> 'SAME' zero padding without any
    # padded scratch.
    acc = jnp.zeros(y.shape, jnp.float32)
    for t, shift in enumerate(shifts):
        tap = y if shift == 0 else pltpu.roll(y, shift, 1)
        acc = acc + tap * (w_dw_ref[t] * mask_ref[t])        # (Cf,1)*(1,S)
    z = _apply_act(acc + b_dw_ref[...], act)                 # (Cf, S)

    # ---- stage 3: 1x1x1 project conv (MXU) + BN shift ------------------------
    out = jnp.dot(w_pl_ref[...], z, preferred_element_type=jnp.float32)
    out = out + b_pl_ref[...]
    o_ref[0] = out.astype(o_ref.dtype)


# ----------------------------------------------------------------------------
# Precompute per-tap roll amounts + boundary masks on the wrapper (hoisted out
# of the kernel; masks stay VMEM-resident for the whole grid).
# ----------------------------------------------------------------------------
def _tap_masks_and_shifts(D, H, W, K):
    S = D * H * W
    p = K // 2
    s = jnp.arange(S, dtype=jnp.int32)
    d = s // (H * W)
    h = (s // W) % H
    w = s % W
    masks, shifts = [], []
    for kd in range(K):
        for kh in range(K):
            for kw in range(K):
                dd, dh, dw = kd - p, kh - p, kw - p
                valid = ((d + dd >= 0) & (d + dd < D) &
                         (h + dh >= 0) & (h + dh < H) &
                         (w + dw >= 0) & (w + dw < W))
                masks.append(valid)
                off = dd * H * W + dh * W + dw
                shifts.append(int((-off) % S))
    mask_arr = jnp.stack(masks).astype(jnp.float32).reshape(K * K * K, 1, S)
    return mask_arr, tuple(shifts)


# ----------------------------------------------------------------------------
# Parameter construction (deterministic, mirrors MBConvLayer.__init__ shapes,
# already in the channel-major layouts the kernel wants).
# ----------------------------------------------------------------------------
def _fold_bn(gamma, beta, mean, var, eps=1e-5):
    scale = gamma / jnp.sqrt(var + eps)
    shift = beta - mean * scale
    return scale.astype(jnp.float32), shift.astype(jnp.float32)


def make_params(key, in_channels, out_channels, kernel_size, expand_ratio):
    feature_dim = round(in_channels * expand_ratio)
    K = kernel_size
    k_ib_w, k_ib_bn, k_dw_w, k_dw_bn, k_pl_w, k_pl_bn = jax.random.split(key, 6)

    def bn(k, c):
        k0, k1, k2, k3 = jax.random.split(k, 4)
        gamma = 1.0 + 0.1 * jax.random.normal(k0, (c,), jnp.float32)
        beta = 0.1 * jax.random.normal(k1, (c,), jnp.float32)
        mean = 0.1 * jax.random.normal(k2, (c,), jnp.float32)
        var = 0.5 + jnp.abs(jax.random.normal(k3, (c,), jnp.float32))
        return _fold_bn(gamma, beta, mean, var)

    params = {}
    if expand_ratio != 1:
        # PyTorch (feature_dim, in_ch, 1,1,1) -> (Cf, Cin)
        w_ib = 0.2 * jax.random.normal(k_ib_w, (feature_dim, in_channels), jnp.float32)
        params["ib"] = (w_ib,) + bn(k_ib_bn, feature_dim)

    # PyTorch (feature_dim, 1, K, K, K) -> taps (K^3, Cf), tap t = kd*K*K+kh*K+kw
    w_dw = 0.2 * jax.random.normal(k_dw_w, (K * K * K, feature_dim), jnp.float32)
    params["dw"] = (w_dw,) + bn(k_dw_bn, feature_dim)

    # PyTorch (out_ch, feature_dim, 1,1,1) -> (Cout, Cf)
    w_pl = 0.2 * jax.random.normal(k_pl_w, (out_channels, feature_dim), jnp.float32)
    params["pl"] = (w_pl,) + bn(k_pl_bn, out_channels)
    return params, feature_dim


# ----------------------------------------------------------------------------
# Forward wrapper: pure reshapes (no transposes), BN-scale folding, pallas_call
# ----------------------------------------------------------------------------
def mbconv_forward(x_ncdhw, params, *, kernel_size=3, expand_ratio=6,
                   act_func="relu6"):
    x_ncdhw = x_ncdhw.astype(jnp.float32)
    N, Cin, D, H, W = x_ncdhw.shape
    K = kernel_size
    S = D * H * W
    x = x_ncdhw.reshape(N, Cin, S)          # NCDHW flattened: NO transpose

    w_dw, s_dw, b_dw = params["dw"]
    w_pl, s_pl, b_pl = params["pl"]
    Cf = w_dw.shape[1]
    Cout = w_pl.shape[0]

    if expand_ratio != 1:
        w_ib, s_ib, b_ib = params["ib"]
        ib_act = act_func
    else:
        # No inverted_bottleneck block: identity "expand", no BN, no activation.
        w_ib = jnp.eye(Cf, Cin, dtype=jnp.float32)
        s_ib = jnp.ones((Cf,), jnp.float32)
        b_ib = jnp.zeros((Cf,), jnp.float32)
        ib_act = None

    # Fold BN scale into conv weights (one-time, wrapper side); shifts as
    # (C, 1) columns so they broadcast along the lane (spatial) axis in-kernel.
    w_ib_f = w_ib * s_ib[:, None]                       # (Cf, Cin)
    w_dw_f = (w_dw * s_dw[None, :])[..., None]          # (K^3, Cf, 1)
    w_pl_f = w_pl * s_pl[:, None]                       # (Cout, Cf)
    b_ib_c = b_ib[:, None]                              # (Cf, 1)
    b_dw_c = b_dw[:, None]                              # (Cf, 1)
    b_pl_c = b_pl[:, None]                              # (Cout, 1)

    # Pad the tiny expand contraction dim up to a full sublane tile (cheap,
    # one-time, exact: zero rows of x meet zero columns of w_ib).
    Cin_p = ((Cin + 7) // 8) * 8
    if Cin_p != Cin:
        x = jnp.pad(x, ((0, 0), (0, Cin_p - Cin), (0, 0)))
        w_ib_f = jnp.pad(w_ib_f, ((0, 0), (0, Cin_p - Cin)))

    masks, shifts = _tap_masks_and_shifts(D, H, W, K)

    kernel = functools.partial(_mbconv_fused_kernel, shifts=shifts,
                               ib_act=ib_act, act=act_func)

    out = pl.pallas_call(
        kernel,
        out_shape=jax.ShapeDtypeStruct((N, Cout, S), jnp.float32),
        grid=(N,),
        in_specs=[
            pl.BlockSpec((1, Cin_p, S), lambda n: (n, 0, 0)),
            pl.BlockSpec((Cf, Cin_p), lambda n: (0, 0)),
            pl.BlockSpec((Cf, 1), lambda n: (0, 0)),
            pl.BlockSpec((K * K * K, Cf, 1), lambda n: (0, 0, 0)),
            pl.BlockSpec((Cf, 1), lambda n: (0, 0)),
            pl.BlockSpec((K * K * K, 1, S), lambda n: (0, 0, 0)),
            pl.BlockSpec((Cout, Cf), lambda n: (0, 0)),
            pl.BlockSpec((Cout, 1), lambda n: (0, 0)),
        ],
        out_specs=pl.BlockSpec((1, Cout, S), lambda n: (n, 0, 0)),
        compiler_params=pltpu.CompilerParams(
            dimension_semantics=("parallel",)),
    )(x, w_ib_f, b_ib_c, w_dw_f, b_dw_c, masks, w_pl_f, b_pl_c)

    return out.reshape(N, Cout, D, H, W)    # pure reshape back to NCDHW


# ----------------------------------------------------------------------------
# Pure-JAX reference (lax.conv, unfolded BN) for correctness checking
# ----------------------------------------------------------------------------
def mbconv_reference(x_ncdhw, params, *, kernel_size=3, expand_ratio=6,
                     act_func="relu6"):
    dn = ("NDHWC", "DHWIO", "NDHWC")
    prec = lax.Precision.HIGHEST
    K = kernel_size
    x = jnp.transpose(x_ncdhw, (0, 2, 3, 4, 1)).astype(jnp.float32)

    if expand_ratio != 1:
        w, s, b = params["ib"]                      # (Cf, Cin)
        wk = jnp.transpose(w, (1, 0)).reshape(1, 1, 1, w.shape[1], w.shape[0])
        x = lax.conv_general_dilated(x, wk, (1, 1, 1), "VALID",
                                     dimension_numbers=dn, precision=prec)
        x = _apply_act(x * s + b, act_func)

    w, s, b = params["dw"]                          # (K^3, Cf)
    C = x.shape[-1]
    wk = w.reshape(K, K, K, 1, C)
    x = lax.conv_general_dilated(x, wk, (1, 1, 1), "SAME",
                                 dimension_numbers=dn,
                                 feature_group_count=C, precision=prec)
    x = _apply_act(x * s + b, act_func)

    w, s, b = params["pl"]                          # (Cout, Cf)
    wk = jnp.transpose(w, (1, 0)).reshape(1, 1, 1, w.shape[1], w.shape[0])
    x = lax.conv_general_dilated(x, wk, (1, 1, 1), "VALID",
                                 dimension_numbers=dn, precision=prec)
    x = x * s + b
    return jnp.transpose(x, (0, 4, 1, 2, 3))


# ----------------------------------------------------------------------------
if __name__ == "__main__":
    # MBConvLayer(in_channels=4, out_channels=8, kernel_size=3, stride=1,
    #             expand_ratio=6, act_func='relu6', use_se=False,
    #             channels_per_group=1)
    in_channels, out_channels = 4, 8
    kernel_size, expand_ratio = 3, 6
    N, D, H, W = 2, 4, 8, 8                     # S = D*H*W = 256 (lane-dense)

    key = jax.random.PRNGKey(0)
    k_x, k_p = jax.random.split(key)
    x = jax.random.normal(k_x, (N, in_channels, D, H, W), jnp.float32)  # NCDHW
    params, feature_dim = make_params(k_p, in_channels, out_channels,
                                      kernel_size, expand_ratio)

    out = mbconv_forward(x, params, kernel_size=kernel_size,
                         expand_ratio=expand_ratio, act_func="relu6")
    out = jax.block_until_ready(out)

    ref = mbconv_reference(x, params, kernel_size=kernel_size,
                           expand_ratio=expand_ratio, act_func="relu6")
    assert out.shape == (N, out_channels, D, H, W), out.shape
    # Tolerance leaves headroom for MXU matmul pass-reduction; structural bugs
    # (tap order / roll direction / masks) would show up as O(0.1 .. 1) errors.
    max_err = float(jnp.max(jnp.abs(out - ref)))
    assert max_err < 5e-3, max_err

    print("KERNEL_OK")
</pallas_src>

<mosaic_0001>
module attributes {stable_mosaic.version = 11 : i64} {
  func.func @_mbconv_fused_kernel(%arg0: i32, %arg1: memref<1x8x256xf32, #tpu.memory_space<vmem>>, %arg2: memref<24x8xf32, #tpu.memory_space<vmem>>, %arg3: memref<24x1xf32, #tpu.memory_space<vmem>>, %arg4: memref<27x24x1xf32, #tpu.memory_space<vmem>>, %arg5: memref<24x1xf32, #tpu.memory_space<vmem>>, %arg6: memref<27x1x256xf32, #tpu.memory_space<vmem>>, %arg7: memref<8x24xf32, #tpu.memory_space<vmem>>, %arg8: memref<8x1xf32, #tpu.memory_space<vmem>>, %arg9: memref<1x8x256xf32, #tpu.memory_space<vmem>>) attributes {dimension_semantics = [#tpu.dimension_semantics<parallel>], iteration_bounds = array<i64: 2>, scalar_prefetch = 0 : i64, scratch_operands = 0 : i64, tpu.core_type = #tpu.core_type<tc>, window_params = [{transform_indices = @transform_0, window_bounds = array<i64: 1, 8, 256>}, {pipeline_mode = #tpu.pipeline_mode<synchronous>, transform_indices = @transform_1, window_bounds = array<i64: 24, 8>}, {pipeline_mode = #tpu.pipeline_mode<synchronous>, transform_indices = @transform_2, window_bounds = array<i64: 24, 1>}, {pipeline_mode = #tpu.pipeline_mode<synchronous>, transform_indices = @transform_3, window_bounds = array<i64: 27, 24, 1>}, {pipeline_mode = #tpu.pipeline_mode<synchronous>, transform_indices = @transform_4, window_bounds = array<i64: 24, 1>}, {pipeline_mode = #tpu.pipeline_mode<synchronous>, transform_indices = @transform_5, window_bounds = array<i64: 27, 1, 256>}, {pipeline_mode = #tpu.pipeline_mode<synchronous>, transform_indices = @transform_6, window_bounds = array<i64: 8, 24>}, {pipeline_mode = #tpu.pipeline_mode<synchronous>, transform_indices = @transform_7, window_bounds = array<i64: 8, 1>}, {transform_indices = @transform_8, window_bounds = array<i64: 1, 8, 256>}]} {
    %c0 = arith.constant 0 : index
    %c0_0 = arith.constant 0 : index
    %c0_1 = arith.constant 0 : index
    %0 = vector.load %arg1[%c0, %c0_0, %c0_1] : memref<1x8x256xf32, #tpu.memory_space<vmem>>, vector<1x8x256xf32>
    %1 = vector.shape_cast %0 : vector<1x8x256xf32> to vector<8x256xf32>
    %c0_2 = arith.constant 0 : index
    %c0_3 = arith.constant 0 : index
    %2 = vector.load %arg2[%c0_2, %c0_3] : memref<24x8xf32, #tpu.memory_space<vmem>>, vector<24x8xf32>
    %cst = arith.constant dense<0.000000e+00> : vector<24x256xf32>
    %3 = tpu.matmul %2, %1, %cst {dimension_numbers = #tpu.dot_dimension_numbers<[1], [0], [0], [1], [0, 0, 1, 1], [], []>} : vector<24x8xf32>, vector<8x256xf32>, vector<24x256xf32> -> vector<24x256xf32>
    %c0_4 = arith.constant 0 : index
    %c0_5 = arith.constant 0 : index
    %4 = vector.load %arg3[%c0_4, %c0_5] : memref<24x1xf32, #tpu.memory_space<vmem>>, vector<24x1xf32>
    %5 = vector.broadcast %4 : vector<24x1xf32> to vector<24x256xf32>
    %6 = arith.addf %3, %5 : vector<24x256xf32>
    %cst_6 = arith.constant 0.000000e+00 : f32
    %cst_7 = arith.constant 6.000000e+00 : f32
    %7 = vector.broadcast %cst_6 : f32 to vector<24x256xf32>
    %8 = arith.maximumf %7, %6 : vector<24x256xf32>
    %9 = vector.broadcast %cst_7 : f32 to vector<24x256xf32>
    %10 = arith.minimumf %9, %8 : vector<24x256xf32>
    %cst_8 = arith.constant 0.000000e+00 : f32
    %11 = vector.broadcast %cst_8 : f32 to vector<24x256xf32>
    %c73_i32 = arith.constant 73 : i32
    %12 = tpu.dynamic_rotate %10 by %c73_i32 dim 1 : vector<24x256xf32>, i32 -> vector<24x256xf32>
    %c0_9 = arith.constant 0 : index
    %c0_10 = arith.constant 0 : index
    %c0_11 = arith.constant 0 : index
    %13 = vector.load %arg4[%c0_9, %c0_10, %c0_11] : memref<27x24x1xf32, #tpu.memory_space<vmem>>, vector<1x24x1xf32>
    %14 = vector.shape_cast %13 : vector<1x24x1xf32> to vector<24x1xf32>
    %c0_12 = arith.constant 0 : index
    %c0_13 = arith.constant 0 : index
    %c0_14 = arith.constant 0 : index
    %15 = vector.load %arg6[%c0_12, %c0_13, %c0_14] : memref<27x1x256xf32, #tpu.memory_space<vmem>>, vector<1x1x256xf32>
    %16 = vector.shape_cast %15 : vector<1x1x256xf32> to vector<1x256xf32>
    %17 = vector.broadcast %14 : vector<24x1xf32> to vector<24x256xf32>
    %18 = vector.broadcast %16 : vector<1x256xf32> to vector<24x256xf32>
    %19 = arith.mulf %17, %18 : vector<24x256xf32>
    %20 = arith.mulf %12, %19 : vector<24x256xf32>
    %21 = arith.addf %11, %20 : vector<24x256xf32>
    %c72_i32 = arith.constant 72 : i32
    %22 = tpu.dynamic_rotate %10 by %c72_i32 dim 1 : vector<24x256xf32>, i32 -> vector<24x256xf32>
    %c1 = arith.constant 1 : index
    %c0_15 = arith.constant 0 : index
    %c0_16 = arith.constant 0 : index
    %23 = vector.load %arg4[%c1, %c0_15, %c0_16] : memref<27x24x1xf32, #tpu.memory_space<vmem>>, vector<1x24x1xf32>
    %24 = vector.shape_cast %23 : vector<1x24x1xf32> to vector<24x1xf32>
    %c1_17 = arith.constant 1 : index
    %c0_18 = arith.constant 0 : index
    %c0_19 = arith.constant 0 : index
    %25 = vector.load %arg6[%c1_17, %c0_18, %c0_19] : memref<27x1x256xf32, #tpu.memory_space<vmem>>, vector<1x1x256xf32>
    %26 = vector.shape_cast %25 : vector<1x1x256xf32> to vector<1x256xf32>
    %27 = vector.broadcast %24 : vector<24x1xf32> to vector<24x256xf32>
    %28 = vector.broadcast %26 : vector<1x256xf32> to vector<24x256xf32>
    %29 = arith.mulf %27, %28 : vector<24x256xf32>
    %30 = arith.mulf %22, %29 : vector<24x256xf32>
    %31 = arith.addf %21, %30 : vector<24x256xf32>
    %c71_i32 = arith.constant 71 : i32
    %32 = tpu.dynamic_rotate %10 by %c71_i32 dim 1 : vector<24x256xf32>, i32 -> vector<24x256xf32>
    %c2 = arith.constant 2 : index
    %c0_20 = arith.constant 0 : index
    %c0_21 = arith.constant 0 : index
    %33 = vector.load %arg4[%c2, %c0_20, %c0_21] : memref<27x24x1xf32, #tpu.memory_space<vmem>>, vector<1x24x1xf32>
    %34 = vector.shape_cast %33 : vector<1x24x1xf32> to vector<24x1xf32>
    %c2_22 = arith.constant 2 : index
    %c0_23 = arith.constant 0 : index
    %c0_24 = arith.constant 0 : index
    %35 = vector.load %arg6[%c2_22, %c0_23, %c0_24] : memref<27x1x256xf32, #tpu.memory_space<vmem>>, vector<1x1x256xf32>
    %36 = vector.shape_cast %35 : vector<1x1x256xf32> to vector<1x256xf32>
    %37 = vector.broadcast %34 : vector<24x1xf32> to vector<24x256xf32>
    %38 = vector.broadcast %36 : vector<1x256xf32> to vector<24x256xf32>
    %39 = arith.mulf %37, %38 : vector<24x256xf32>
    %40 = arith.mulf %32, %39 : vector<24x256xf32>
    %41 = arith.addf %31, %40 : vector<24x256xf32>
    %c65_i32 = arith.constant 65 : i32
    %42 = tpu.dynamic_rotate %10 by %c65_i32 dim 1 : vector<24x256xf32>, i32 -> vector<24x256xf32>
    %c3 = arith.constant 3 : index
    %c0_25 = arith.constant 0 : index
    %c0_26 = arith.constant 0 : index
    %43 = vector.load %arg4[%c3, %c0_25, %c0_26] : memref<27x24x1xf32, #tpu.memory_space<vmem>>, vector<1x24x1xf32>
    %44 = vector.shape_cast %43 : vector<1x24x1xf32> to vector<24x1xf32>
    %c3_27 = arith.constant 3 : index
    %c0_28 = arith.constant 0 : index
    %c0_29 = arith.constant 0 : index
    %45 = vector.load %arg6[%c3_27, %c0_28, %c0_29] : memref<27x1x256xf32, #tpu.memory_space<vmem>>, vector<1x1x256xf32>
    %46 = vector.shape_cast %45 : vector<1x1x256xf32> to vector<1x256xf32>
    %47 = vector.broadcast %44 : vector<24x1xf32> to vector<24x256xf32>
    %48 = vector.broadcast %46 : vector<1x256xf32> to vector<24x256xf32>
    %49 = arith.mulf %47, %48 : vector<24x256xf32>
    %50 = arith.mulf %42, %49 : vector<24x256xf32>
    %51 = arith.addf %41, %50 : vector<24x256xf32>
    %c64_i32 = arith.constant 64 : i32
    %52 = tpu.dynamic_rotate %10 by %c64_i32 dim 1 : vector<24x256xf32>, i32 -> vector<24x256xf32>
    %c4 = arith.constant 4 : index
    %c0_30 = arith.constant 0 : index
    %c0_31 = arith.constant 0 : index
    %53 = vector.load %arg4[%c4, %c0_30, %c0_31] : memref<27x24x1xf32, #tpu.memory_space<vmem>>, vector<1x24x1xf32>
    %54 = vector.shape_cast %53 : vector<1x24x1xf32> to vector<24x1xf32>
    %c4_32 = arith.constant 4 : index
    %c0_33 = arith.constant 0 : index
    %c0_34 = arith.constant 0 : index
    %55 = vector.load %arg6[%c4_32, %c0_33, %c0_34] : memref<27x1x256xf32, #tpu.memory_space<vmem>>, vector<1x1x256xf32>
    %56 = vector.shape_cast %55 : vector<1x1x256xf32> to vector<1x256xf32>
    %57 = vector.broadcast %54 : vector<24x1xf32> to vector<24x256xf32>
    %58 = vector.broadcast %56 : vector<1x256xf32> to vector<24x256xf32>
    %59 = arith.mulf %57, %58 : vector<24x256xf32>
    %60 = arith.mulf %52, %59 : vector<24x256xf32>
    %61 = arith.addf %51, %60 : vector<24x256xf32>
    %c63_i32 = arith.constant 63 : i32
    %62 = tpu.dynamic_rotate %10 by %c63_i32 dim 1 : vector<24x256xf32>, i32 -> vector<24x256xf32>
    %c5 = arith.constant 5 : index
    %c0_35 = arith.constant 0 : index
    %c0_36 = arith.constant 0 : index
    %63 = vector.load %arg4[%c5, %c0_35, %c0_36] : memref<27x24x1xf32, #tpu.memory_space<vmem>>, vector<1x24x1xf32>
    %64 = vector.shape_cast %63 : vector<1x24x1xf32> to vector<24x1xf32>
    %c5_37 = arith.constant 5 : index
    %c0_38 = arith.constant 0 : index
    %c0_39 = arith.constant 0 : index
    %65 = vector.load %arg6[%c5_37, %c0_38, %c0_39] : memref<27x1x256xf32, #tpu.memory_space<vmem>>, vector<1x1x256xf32>
    %66 = vector.shape_cast %65 : vector<1x1x256xf32> to vector<1x256xf32>
    %67 = vector.broadcast %64 : vector<24x1xf32> to vector<24x256xf32>
    %68 = vector.broadcast %66 : vector<1x256xf32> to vector<24x256xf32>
    %69 = arith.mulf %67, %68 : vector<24x256xf32>
    %70 = arith.mulf %62, %69 : vector<24x256xf32>
    %71 = arith.addf %61, %70 : vector<24x256xf32>
    %c57_i32 = arith.constant 57 : i32
    %72 = tpu.dynamic_rotate %10 by %c57_i32 dim 1 : vector<24x256xf32>, i32 -> vector<24x256xf32>
    %c6 = arith.constant 6 : index
    %c0_40 = arith.constant 0 : index
    %c0_41 = arith.constant 0 : index
    %73 = vector.load %arg4[%c6, %c0_40, %c0_41] : memref<27x24x1xf32, #tpu.memory_space<vmem>>, vector<1x24x1xf32>
    %74 = vector.shape_cast %73 : vector<1x24x1xf32> to vector<24x1xf32>
    %c6_42 = arith.constant 6 : index
    %c0_43 = arith.constant 0 : index
    %c0_44 = arith.constant 0 : index
    %75 = vector.load %arg6[%c6_42, %c0_43, %c0_44] : memref<27x1x256xf32, #tpu.memory_space<vmem>>, vector<1x1x256xf32>
    %76 = vector.shape_cast %75 : vector<1x1x256xf32> to vector<1x256xf32>
    %77 = vector.broadcast %74 : vector<24x1xf32> to vector<24x256xf32>
    %78 = vector.broadcast %76 : vector<1x256xf32> to vector<24x256xf32>
    %79 = arith.mulf %77, %78 : vector<24x256xf32>
    %80 = arith.mulf %72, %79 : vector<24x256xf32>
    %81 = arith.addf %71, %80 : vector<24x256xf32>
    %c56_i32 = arith.constant 56 : i32
    %82 = tpu.dynamic_rotate %10 by %c56_i32 dim 1 : vector<24x256xf32>, i32 -> vector<24x256xf32>
    %c7 = arith.constant 7 : index
    %c0_45 = arith.constant 0 : index
    %c0_46 = arith.constant 0 : index
    %83 = vector.load %arg4[%c7, %c0_45, %c0_46] : memref<27x24x1xf32, #tpu.memory_space<vmem>>, vector<1x24x1xf32>
    %84 = vector.shape_cast %83 : vector<1x24x1xf32> to vector<24x1xf32>
    %c7_47 = arith.constant 7 : index
    %c0_48 = arith.constant 0 : index
    %c0_49 = arith.constant 0 : index
    %85 = vector.load %arg6[%c7_47, %c0_48, %c0_49] : memref<27x1x256xf32, #tpu.memory_space<vmem>>, vector<1x1x256xf32>
    %86 = vector.shape_cast %85 : vector<1x1x256xf32> to vector<1x256xf32>
    %87 = vector.broadcast %84 : vector<24x1xf32> to vector<24x256xf32>
    %88 = vector.broadcast %86 : vector<1x256xf32> to vector<24x256xf32>
    %89 = arith.mulf %87, %88 : vector<24x256xf32>
    %90 = arith.mulf %82, %89 : vector<24x256xf32>
    %91 = arith.addf %81, %90 : vector<24x256xf32>
    %c55_i32 = arith.constant 55 : i32
    %92 = tpu.dynamic_rotate %10 by %c55_i32 dim 1 : vector<24x256xf32>, i32 -> vector<24x256xf32>
    %c8 = arith.constant 8 : index
    %c0_50 = arith.constant 0 : index
    %c0_51 = arith.constant 0 : index
    %93 = vector.load %arg4[%c8, %c0_50, %c0_51] : memref<27x24x1xf32, #tpu.memory_space<vmem>>, vector<1x24x1xf32>
    %94 = vector.shape_cast %93 : vector<1x24x1xf32> to vector<24x1xf32>
    %c8_52 = arith.constant 8 : index
    %c0_53 = arith.constant 0 : index
    %c0_54 = arith.constant 0 : index
    %95 = vector.load %arg6[%c8_52, %c0_53, %c0_54] : memref<27x1x256xf32, #tpu.memory_space<vmem>>, vector<1x1x256xf32>
    %96 = vector.shape_cast %95 : vector<1x1x256xf32> to vector<1x256xf32>
    %97 = vector.broadcast %94 : vector<24x1xf32> to vector<24x256xf32>
    %98 = vector.broadcast %96 : vector<1x256xf32> to vector<24x256xf32>
    %99 = arith.mulf %97, %98 : vector<24x256xf32>
    %100 = arith.mulf %92, %99 : vector<24x256xf32>
    %101 = arith.addf %91, %100 : vector<24x256xf32>
    %c9_i32 = arith.constant 9 : i32
    %102 = tpu.dynamic_rotate %10 by %c9_i32 dim 1 : vector<24x256xf32>, i32 -> vector<24x256xf32>
    %c9 = arith.constant 9 : index
    %c0_55 = arith.constant 0 : index
    %c0_56 = arith.constant 0 : index
    %103 = vector.load %arg4[%c9, %c0_55, %c0_56] : memref<27x24x1xf32, #tpu.memory_space<vmem>>, vector<1x24x1xf32>
    %104 = vector.shape_cast %103 : vector<1x24x1xf32> to vector<24x1xf32>
    %c9_57 = arith.constant 9 : index
    %c0_58 = arith.constant 0 : index
    %c0_59 = arith.constant 0 : index
    %105 = vector.load %arg6[%c9_57, %c0_58, %c0_59] : memref<27x1x256xf32, #tpu.memory_space<vmem>>, vector<1x1x256xf32>
    %106 = vector.shape_cast %105 : vector<1x1x256xf32> to vector<1x256xf32>
    %107 = vector.broadcast %104 : vector<24x1xf32> to vector<24x256xf32>
    %108 = vector.broadcast %106 : vector<1x256xf32> to vector<24x256xf32>
    %109 = arith.mulf %107, %108 : vector<24x256xf32>
    %110 = arith.mulf %102, %109 : vector<24x256xf32>
    %111 = arith.addf %101, %110 : vector<24x256xf32>
    %c8_i32 = arith.constant 8 : i32
    %112 = tpu.dynamic_rotate %10 by %c8_i32 dim 1 : vector<24x256xf32>, i32 -> vector<24x256xf32>
    %c10 = arith.constant 10 : index
    %c0_60 = arith.constant 0 : index
    %c0_61 = arith.constant 0 : index
    %113 = vector.load %arg4[%c10, %c0_60, %c0_61] : memref<27x24x1xf32, #tpu.memory_space<vmem>>, vector<1x24x1xf32>
    %114 = vector.shape_cast %113 : vector<1x24x1xf32> to vector<24x1xf32>
    %c10_62 = arith.constant 10 : index
    %c0_63 = arith.constant 0 : index
    %c0_64 = arith.constant 0 : index
    %115 = vector.load %arg6[%c10_62, %c0_63, %c0_64] : memref<27x1x256xf32, #tpu.memory_space<vmem>>, vector<1x1x256xf32>
    %116 = vector.shape_cast %115 : vector<1x1x256xf32> to vector<1x256xf32>
    %117 = vector.broadcast %114 : vector<24x1xf32> to vector<24x256xf32>
    %118 = vector.broadcast %116 : vector<1x256xf32> to vector<24x256xf32>
    %119 = arith.mulf %117, %118 : vector<24x256xf32>
    %120 = arith.mulf %112, %119 : vector<24x256xf32>
    %121 = arith.addf %111, %120 : vector<24x256xf32>
    %c7_i32 = arith.constant 7 : i32
    %122 = tpu.dynamic_rotate %10 by %c7_i32 dim 1 : vector<24x256xf32>, i32 -> vector<24x256xf32>
    %c11 = arith.constant 11 : index
    %c0_65 = arith.constant 0 : index
    %c0_66 = arith.constant 0 : index
    %123 = vector.load %arg4[%c11, %c0_65, %c0_66] : memref<27x24x1xf32, #tpu.memory_space<vmem>>, vector<1x24x1xf32>
    %124 = vector.shape_cast %123 : vector<1x24x1xf32> to vector<24x1xf32>
    %c11_67 = arith.constant 11 : index
    %c0_68 = arith.constant 0 : index
    %c0_69 = arith.constant 0 : index
    %125 = vector.load %arg6[%c11_67, %c0_68, %c0_69] : memref<27x1x256xf32, #tpu.memory_space<vmem>>, vector<1x1x256xf32>
    %126 = vector.shape_cast %125 : vector<1x1x256xf32> to vector<1x256xf32>
    %127 = vector.broadcast %124 : vector<24x1xf32> to vector<24x256xf32>
    %128 = vector.broadcast %126 : vector<1x256xf32> to vector<24x256xf32>
    %129 = arith.mulf %127, %128 : vector<24x256xf32>
    %130 = arith.mulf %122, %129 : vector<24x256xf32>
    %131 = arith.addf %121, %130 : vector<24x256xf32>
    %c1_i32 = arith.constant 1 : i32
    %132 = tpu.dynamic_rotate %10 by %c1_i32 dim 1 : vector<24x256xf32>, i32 -> vector<24x256xf32>
    %c12 = arith.constant 12 : index
    %c0_70 = arith.constant 0 : index
    %c0_71 = arith.constant 0 : index
    %133 = vector.load %arg4[%c12, %c0_70, %c0_71] : memref<27x24x1xf32, #tpu.memory_space<vmem>>, vector<1x24x1xf32>
    %134 = vector.shape_cast %133 : vector<1x24x1xf32> to vector<24x1xf32>
    %c12_72 = arith.constant 12 : index
    %c0_73 = arith.constant 0 : index
    %c0_74 = arith.constant 0 : index
    %135 = vector.load %arg6[%c12_72, %c0_73, %c0_74] : memref<27x1x256xf32, #tpu.memory_space<vmem>>, vector<1x1x256xf32>
    %136 = vector.shape_cast %135 : vector<1x1x256xf32> to vector<1x256xf32>
    %137 = vector.broadcast %134 : vector<24x1xf32> to vector<24x256xf32>
    %138 = vector.broadcast %136 : vector<1x256xf32> to vector<24x256xf32>
    %139 = arith.mulf %137, %138 : vector<24x256xf32>
    %140 = arith.mulf %132, %139 : vector<24x256xf32>
    %141 = arith.addf %131, %140 : vector<24x256xf32>
    %c13 = arith.constant 13 : index
    %c0_75 = arith.constant 0 : index
    %c0_76 = arith.constant 0 : index
    %142 = vector.load %arg4[%c13, %c0_75, %c0_76] : memref<27x24x1xf32, #tpu.memory_space<vmem>>, vector<1x24x1xf32>
    %143 = vector.shape_cast %142 : vector<1x24x1xf32> to vector<24x1xf32>
    %c13_77 = arith.constant 13 : index
    %c0_78 = arith.constant 0 : index
    %c0_79 = arith.constant 0 : index
    %144 = vector.load %arg6[%c13_77, %c0_78, %c0_79] : memref<27x1x256xf32, #tpu.memory_space<vmem>>, vector<1x1x256xf32>
    %145 = vector.shape_cast %144 : vector<1x1x256xf32> to vector<1x256xf32>
    %146 = vector.broadcast %143 : vector<24x1xf32> to vector<24x256xf32>
    %147 = vector.broadcast %145 : vector<1x256xf32> to vector<24x256xf32>
    %148 = arith.mulf %146, %147 : vector<24x256xf32>
    %149 = arith.mulf %10, %148 : vector<24x256xf32>
    %150 = arith.addf %141, %149 : vector<24x256xf32>
    %c255_i32 = arith.constant 255 : i32
    %151 = tpu.dynamic_rotate %10 by %c255_i32 dim 1 : vector<24x256xf32>, i32 -> vector<24x256xf32>
    %c14 = arith.constant 14 : index
    %c0_80 = arith.constant 0 : index
    %c0_81 = arith.constant 0 : index
    %152 = vector.load %arg4[%c14, %c0_80, %c0_81] : memref<27x24x1xf32, #tpu.memory_space<vmem>>, vector<1x24x1xf32>
    %153 = vector.shape_cast %152 : vector<1x24x1xf32> to vector<24x1xf32>
    %c14_82 = arith.constant 14 : index
    %c0_83 = arith.constant 0 : index
    %c0_84 = arith.constant 0 : index
    %154 = vector.load %arg6[%c14_82, %c0_83, %c0_84] : memref<27x1x256xf32, #tpu.memory_space<vmem>>, vector<1x1x256xf32>
    %155 = vector.shape_cast %154 : vector<1x1x256xf32> to vector<1x256xf32>
    %156 = vector.broadcast %153 : vector<24x1xf32> to vector<24x256xf32>
    %157 = vector.broadcast %155 : vector<1x256xf32> to vector<24x256xf32>
    %158 = arith.mulf %156, %157 : vector<24x256xf32>
    %159 = arith.mulf %151, %158 : vector<24x256xf32>
    %160 = arith.addf %150, %159 : vector<24x256xf32>
    %c249_i32 = arith.constant 249 : i32
    %161 = tpu.dynamic_rotate %10 by %c249_i32 dim 1 : vector<24x256xf32>, i32 -> vector<24x256xf32>
    %c15 = arith.constant 15 : index
    %c0_85 = arith.constant 0 : index
    %c0_86 = arith.constant 0 : index
    %162 = vector.load %arg4[%c15, %c0_85, %c0_86] : memref<27x24x1xf32, #tpu.memory_space<vmem>>, vector<1x24x1xf32>
    %163 = vector.shape_cast %162 : vector<1x24x1xf32> to vector<24x1xf32>
    %c15_87 = arith.constant 15 : index
    %c0_88 = arith.constant 0 : index
    %c0_89 = arith.constant 0 : index
    %164 = vector.load %arg6[%c15_87, %c0_88, %c0_89] : memref<27x1x256xf32, #tpu.memory_space<vmem>>, vector<1x1x256xf32>
    %165 = vector.shape_cast %164 : vector<1x1x256xf32> to vector<1x256xf32>
    %166 = vector.broadcast %163 : vector<24x1xf32> to vector<24x256xf32>
    %167 = vector.broadcast %165 : vector<1x256xf32> to vector<24x256xf32>
    %168 = arith.mulf %166, %167 : vector<24x256xf32>
    %169 = arith.mulf %161, %168 : vector<24x256xf32>
    %170 = arith.addf %160, %169 : vector<24x256xf32>
    %c248_i32 = arith.constant 248 : i32
    %171 = tpu.dynamic_rotate %10 by %c248_i32 dim 1 : vector<24x256xf32>, i32 -> vector<24x256xf32>
    %c16 = arith.constant 16 : index
    %c0_90 = arith.constant 0 : index
    %c0_91 = arith.constant 0 : index
    %172 = vector.load %arg4[%c16, %c0_90, %c0_91] : memref<27x24x1xf32, #tpu.memory_space<vmem>>, vector<1x24x1xf32>
    %173 = vector.shape_cast %172 : vector<1x24x1xf32> to vector<24x1xf32>
    %c16_92 = arith.constant 16 : index
    %c0_93 = arith.constant 0 : index
    %c0_94 = arith.constant 0 : index
    %174 = vector.load %arg6[%c16_92, %c0_93, %c0_94] : memref<27x1x256xf32, #tpu.memory_space<vmem>>, vector<1x1x256xf32>
    %175 = vector.shape_cast %174 : vector<1x1x256xf32> to vector<1x256xf32>
    %176 = vector.broadcast %173 : vector<24x1xf32> to vector<24x256xf32>
    %177 = vector.broadcast %175 : vector<1x256xf32> to vector<24x256xf32>
    %178 = arith.mulf %176, %177 : vector<24x256xf32>
    %179 = arith.mulf %171, %178 : vector<24x256xf32>
    %180 = arith.addf %170, %179 : vector<24x256xf32>
    %c247_i32 = arith.constant 247 : i32
    %181 = tpu.dynamic_rotate %10 by %c247_i32 dim 1 : vector<24x256xf32>, i32 -> vector<24x256xf32>
    %c17 = arith.constant 17 : index
    %c0_95 = arith.constant 0 : index
    %c0_96 = arith.constant 0 : index
    %182 = vector.load %arg4[%c17, %c0_95, %c0_96] : memref<27x24x1xf32, #tpu.memory_space<vmem>>, vector<1x24x1xf32>
    %183 = vector.shape_cast %182 : vector<1x24x1xf32> to vector<24x1xf32>
    %c17_97 = arith.constant 17 : index
    %c0_98 = arith.constant 0 : index
    %c0_99 = arith.constant 0 : index
    %184 = vector.load %arg6[%c17_97, %c0_98, %c0_99] : memref<27x1x256xf32, #tpu.memory_space<vmem>>, vector<1x1x256xf32>
    %185 = vector.shape_cast %184 : vector<1x1x256xf32> to vector<1x256xf32>
    %186 = vector.broadcast %183 : vector<24x1xf32> to vector<24x256xf32>
    %187 = vector.broadcast %185 : vector<1x256xf32> to vector<24x256xf32>
    %188 = arith.mulf %186, %187 : vector<24x256xf32>
    %189 = arith.mulf %181, %188 : vector<24x256xf32>
    %190 = arith.addf %180, %189 : vector<24x256xf32>
    %c201_i32 = arith.constant 201 : i32
    %191 = tpu.dynamic_rotate %10 by %c201_i32 dim 1 : vector<24x256xf32>, i32 -> vector<24x256xf32>
    %c18 = arith.constant 18 : index
    %c0_100 = arith.constant 0 : index
    %c0_101 = arith.constant 0 : index
    %192 = vector.load %arg4[%c18, %c0_100, %c0_101] : memref<27x24x1xf32, #tpu.memory_space<vmem>>, vector<1x24x1xf32>
    %193 = vector.shape_cast %192 : vector<1x24x1xf32> to vector<24x1xf32>
    %c18_102 = arith.constant 18 : index
    %c0_103 = arith.constant 0 : index
    %c0_104 = arith.constant 0 : index
    %194 = vector.load %arg6[%c18_102, %c0_103, %c0_104] : memref<27x1x256xf32, #tpu.memory_space<vmem>>, vector<1x1x256xf32>
    %195 = vector.shape_cast %194 : vector<1x1x256xf32> to vector<1x256xf32>
    %196 = vector.broadcast %193 : vector<24x1xf32> to vector<24x256xf32>
    %197 = vector.broadcast %195 : vector<1x256xf32> to vector<24x256xf32>
    %198 = arith.mulf %196, %197 : vector<24x256xf32>
    %199 = arith.mulf %191, %198 : vector<24x256xf32>
    %200 = arith.addf %190, %199 : vector<24x256xf32>
    %c200_i32 = arith.constant 200 : i32
    %201 = tpu.dynamic_rotate %10 by %c200_i32 dim 1 : vector<24x256xf32>, i32 -> vector<24x256xf32>
    %c19 = arith.constant 19 : index
    %c0_105 = arith.constant 0 : index
    %c0_106 = arith.constant 0 : index
    %202 = vector.load %arg4[%c19, %c0_105, %c0_106] : memref<27x24x1xf32, #tpu.memory_space<vmem>>, vector<1x24x1xf32>
    %203 = vector.shape_cast %202 : vector<1x24x1xf32> to vector<24x1xf32>
    %c19_107 = arith.constant 19 : index
    %c0_108 = arith.constant 0 : index
    %c0_109 = arith.constant 0 : index
    %204 = vector.load %arg6[%c19_107, %c0_108, %c0_109] : memref<27x1x256xf32, #tpu.memory_space<vmem>>, vector<1x1x256xf32>
    %205 = vector.shape_cast %204 : vector<1x1x256xf32> to vector<1x256xf32>
    %206 = vector.broadcast %203 : vector<24x1xf32> to vector<24x256xf32>
    %207 = vector.broadcast %205 : vector<1x256xf32> to vector<24x256xf32>
    %208 = arith.mulf %206, %207 : vector<24x256xf32>
    %209 = arith.mulf %201, %208 : vector<24x256xf32>
    %210 = arith.addf %200, %209 : vector<24x256xf32>
    %c199_i32 = arith.constant 199 : i32
    %211 = tpu.dynamic_rotate %10 by %c199_i32 dim 1 : vector<24x256xf32>, i32 -> vector<24x256xf32>
    %c20 = arith.constant 20 : index
    %c0_110 = arith.constant 0 : index
    %c0_111 = arith.constant 0 : index
    %212 = vector.load %arg4[%c20, %c0_110, %c0_111] : memref<27x24x1xf32, #tpu.memory_space<vmem>>, vector<1x24x1xf32>
    %213 = vector.shape_cast %212 : vector<1x24x1xf32> to vector<24x1xf32>
    %c20_112 = arith.constant 20 : index
    %c0_113 = arith.constant 0 : index
    %c0_114 = arith.constant 0 : index
    %214 = vector.load %arg6[%c20_112, %c0_113, %c0_114] : memref<27x1x256xf32, #tpu.memory_space<vmem>>, vector<1x1x256xf32>
    %215 = vector.shape_cast %214 : vector<1x1x256xf32> to vector<1x256xf32>
    %216 = vector.broadcast %213 : vector<24x1xf32> to vector<24x256xf32>
    %217 = vector.broadcast %215 : vector<1x256xf32> to vector<24x256xf32>
    %218 = arith.mulf %216, %217 : vector<24x256xf32>
    %219 = arith.mulf %211, %218 : vector<24x256xf32>
    %220 = arith.addf %210, %219 : vector<24x256xf32>
    %c193_i32 = arith.constant 193 : i32
    %221 = tpu.dynamic_rotate %10 by %c193_i32 dim 1 : vector<24x256xf32>, i32 -> vector<24x256xf32>
    %c21 = arith.constant 21 : index
    %c0_115 = arith.constant 0 : index
    %c0_116 = arith.constant 0 : index
    %222 = vector.load %arg4[%c21, %c0_115, %c0_116] : memref<27x24x1xf32, #tpu.memory_space<vmem>>, vector<1x24x1xf32>
    %223 = vector.shape_cast %222 : vector<1x24x1xf32> to vector<24x1xf32>
    %c21_117 = arith.constant 21 : index
    %c0_118 = arith.constant 0 : index
    %c0_119 = arith.constant 0 : index
    %224 = vector.load %arg6[%c21_117, %c0_118, %c0_119] : memref<27x1x256xf32, #tpu.memory_space<vmem>>, vector<1x1x256xf32>
    %225 = vector.shape_cast %224 : vector<1x1x256xf32> to vector<1x256xf32>
    %226 = vector.broadcast %223 : vector<24x1xf32> to vector<24x256xf32>
    %227 = vector.broadcast %225 : vector<1x256xf32> to vector<24x256xf32>
    %228 = arith.mulf %226, %227 : vector<24x256xf32>
    %229 = arith.mulf %221, %228 : vector<24x256xf32>
    %230 = arith.addf %220, %229 : vector<24x256xf32>
    %c192_i32 = arith.constant 192 : i32
    %231 = tpu.dynamic_rotate %10 by %c192_i32 dim 1 : vector<24x256xf32>, i32 -> vector<24x256xf32>
    %c22 = arith.constant 22 : index
    %c0_120 = arith.constant 0 : index
    %c0_121 = arith.constant 0 : index
    %232 = vector.load %arg4[%c22, %c0_120, %c0_121] : memref<27x24x1xf32, #tpu.memory_space<vmem>>, vector<1x24x1xf32>
    %233 = vector.shape_cast %232 : vector<1x24x1xf32> to vector<24x1xf32>
    %c22_122 = arith.constant 22 : index
    %c0_123 = arith.constant 0 : index
    %c0_124 = arith.constant 0 : index
    %234 = vector.load %arg6[%c22_122, %c0_123, %c0_124] : memref<27x1x256xf32, #tpu.memory_space<vmem>>, vector<1x1x256xf32>
    %235 = vector.shape_cast %234 : vector<1x1x256xf32> to vector<1x256xf32>
    %236 = vector.broadcast %233 : vector<24x1xf32> to vector<24x256xf32>
    %237 = vector.broadcast %235 : vector<1x256xf32> to vector<24x256xf32>
    %238 = arith.mulf %236, %237 : vector<24x256xf32>
    %239 = arith.mulf %231, %238 : vector<24x256xf32>
    %240 = arith.addf %230, %239 : vector<24x256xf32>
    %c191_i32 = arith.constant 191 : i32
    %241 = tpu.dynamic_rotate %10 by %c191_i32 dim 1 : vector<24x256xf32>, i32 -> vector<24x256xf32>
    %c23 = arith.constant 23 : index
    %c0_125 = arith.constant 0 : index
    %c0_126 = arith.constant 0 : index
    %242 = vector.load %arg4[%c23, %c0_125, %c0_126] : memref<27x24x1xf32, #tpu.memory_space<vmem>>, vector<1x24x1xf32>
    %243 = vector.shape_cast %242 : vector<1x24x1xf32> to vector<24x1xf32>
    %c23_127 = arith.constant 23 : index
    %c0_128 = arith.constant 0 : index
    %c0_129 = arith.constant 0 : index
    %244 = vector.load %arg6[%c23_127, %c0_128, %c0_129] : memref<27x1x256xf32, #tpu.memory_space<vmem>>, vector<1x1x256xf32>
    %245 = vector.shape_cast %244 : vector<1x1x256xf32> to vector<1x256xf32>
    %246 = vector.broadcast %243 : vector<24x1xf32> to vector<24x256xf32>
    %247 = vector.broadcast %245 : vector<1x256xf32> to vector<24x256xf32>
    %248 = arith.mulf %246, %247 : vector<24x256xf32>
    %249 = arith.mulf %241, %248 : vector<24x256xf32>
    %250 = arith.addf %240, %249 : vector<24x256xf32>
    %c185_i32 = arith.constant 185 : i32
    %251 = tpu.dynamic_rotate %10 by %c185_i32 dim 1 : vector<24x256xf32>, i32 -> vector<24x256xf32>
    %c24 = arith.constant 24 : index
    %c0_130 = arith.constant 0 : index
    %c0_131 = arith.constant 0 : index
    %252 = vector.load %arg4[%c24, %c0_130, %c0_131] : memref<27x24x1xf32, #tpu.memory_space<vmem>>, vector<1x24x1xf32>
    %253 = vector.shape_cast %252 : vector<1x24x1xf32> to vector<24x1xf32>
    %c24_132 = arith.constant 24 : index
    %c0_133 = arith.constant 0 : index
    %c0_134 = arith.constant 0 : index
    %254 = vector.load %arg6[%c24_132, %c0_133, %c0_134] : memref<27x1x256xf32, #tpu.memory_space<vmem>>, vector<1x1x256xf32>
    %255 = vector.shape_cast %254 : vector<1x1x256xf32> to vector<1x256xf32>
    %256 = vector.broadcast %253 : vector<24x1xf32> to vector<24x256xf32>
    %257 = vector.broadcast %255 : vector<1x256xf32> to vector<24x256xf32>
    %258 = arith.mulf %256, %257 : vector<24x256xf32>
    %259 = arith.mulf %251, %258 : vector<24x256xf32>
    %260 = arith.addf %250, %259 : vector<24x256xf32>
    %c184_i32 = arith.constant 184 : i32
    %261 = tpu.dynamic_rotate %10 by %c184_i32 dim 1 : vector<24x256xf32>, i32 -> vector<24x256xf32>
    %c25 = arith.constant 25 : index
    %c0_135 = arith.constant 0 : index
    %c0_136 = arith.constant 0 : index
    %262 = vector.load %arg4[%c25, %c0_135, %c0_136] : memref<27x24x1xf32, #tpu.memory_space<vmem>>, vector<1x24x1xf32>
    %263 = vector.shape_cast %262 : vector<1x24x1xf32> to vector<24x1xf32>
    %c25_137 = arith.constant 25 : index
    %c0_138 = arith.constant 0 : index
    %c0_139 = arith.constant 0 : index
    %264 = vector.load %arg6[%c25_137, %c0_138, %c0_139] : memref<27x1x256xf32, #tpu.memory_space<vmem>>, vector<1x1x256xf32>
    %265 = vector.shape_cast %264 : vector<1x1x256xf32> to vector<1x256xf32>
    %266 = vector.broadcast %263 : vector<24x1xf32> to vector<24x256xf32>
    %267 = vector.broadcast %265 : vector<1x256xf32> to vector<24x256xf32>
    %268 = arith.mulf %266, %267 : vector<24x256xf32>
    %269 = arith.mulf %261, %268 : vector<24x256xf32>
    %270 = arith.addf %260, %269 : vector<24x256xf32>
    %c183_i32 = arith.constant 183 : i32
    %271 = tpu.dynamic_rotate %10 by %c183_i32 dim 1 : vector<24x256xf32>, i32 -> vector<24x256xf32>
    %c26 = arith.constant 26 : index
    %c0_140 = arith.constant 0 : index
    %c0_141 = arith.constant 0 : index
    %272 = vector.load %arg4[%c26, %c0_140, %c0_141] : memref<27x24x1xf32, #tpu.memory_space<vmem>>, vector<1x24x1xf32>
    %273 = vector.shape_cast %272 : vector<1x24x1xf32> to vector<24x1xf32>
    %c26_142 = arith.constant 26 : index
    %c0_143 = arith.constant 0 : index
    %c0_144 = arith.constant 0 : index
    %274 = vector.load %arg6[%c26_142, %c0_143, %c0_144] : memref<27x1x256xf32, #tpu.memory_space<vmem>>, vector<1x1x256xf32>
    %275 = vector.shape_cast %274 : vector<1x1x256xf32> to vector<1x256xf32>
    %276 = vector.broadcast %273 : vector<24x1xf32> to vector<24x256xf32>
    %277 = vector.broadcast %275 : vector<1x256xf32> to vector<24x256xf32>
    %278 = arith.mulf %276, %277 : vector<24x256xf32>
    %279 = arith.mulf %271, %278 : vector<24x256xf32>
    %280 = arith.addf %270, %279 : vector<24x256xf32>
    %c0_145 = arith.constant 0 : index
    %c0_146 = arith.constant 0 : index
    %281 = vector.load %arg5[%c0_145, %c0_146] : memref<24x1xf32, #tpu.memory_space<vmem>>, vector<24x1xf32>
    %282 = vector.broadcast %281 : vector<24x1xf32> to vector<24x256xf32>
    %283 = arith.addf %280, %282 : vector<24x256xf32>
    %cst_147 = arith.constant 0.000000e+00 : f32
    %cst_148 = arith.constant 6.000000e+00 : f32
    %284 = vector.broadcast %cst_147 : f32 to vector<24x256xf32>
    %285 = arith.maximumf %284, %283 : vector<24x256xf32>
    %286 = vector.broadcast %cst_148 : f32 to vector<24x256xf32>
    %287 = arith.minimumf %286, %285 : vector<24x256xf32>
    %c0_149 = arith.constant 0 : index
    %c0_150 = arith.constant 0 : index
    %288 = vector.load %arg7[%c0_149, %c0_150] : memref<8x24xf32, #tpu.memory_space<vmem>>, vector<8x24xf32>
    %cst_151 = arith.constant dense<0.000000e+00> : vector<8x256xf32>
    %289 = tpu.matmul %288, %287, %cst_151 {dimension_numbers = #tpu.dot_dimension_numbers<[1], [0], [0], [1], [0, 0, 1, 1], [], []>} : vector<8x24xf32>, vector<24x256xf32>, vector<8x256xf32> -> vector<8x256xf32>
    %c0_152 = arith.constant 0 : index
    %c0_153 = arith.constant 0 : index
    %290 = vector.load %arg8[%c0_152, %c0_153] : memref<8x1xf32, #tpu.memory_space<vmem>>, vector<8x1xf32>
    %291 = vector.broadcast %290 : vector<8x1xf32> to vector<8x256xf32>
    %292 = arith.addf %289, %291 : vector<8x256xf32>
    %c0_154 = arith.constant 0 : index
    %c0_155 = arith.constant 0 : index
    %c0_156 = arith.constant 0 : index
    %293 = vector.load %arg9[%c0_154, %c0_155, %c0_156] : memref<1x8x256xf32, #tpu.memory_space<vmem>>, vector<1x8x256xf32>
    %294 = vector.shape_cast %293 : vector<1x8x256xf32> to vector<8x256xf32>
    %295 = vector.shape_cast %292 : vector<8x256xf32> to vector<1x8x256xf32>
    tpu.vector_store %arg9[%c0_154, %c0_155, %c0_156], %295 {strides = array<i32>} : memref<1x8x256xf32, #tpu.memory_space<vmem>>, vector<1x8x256xf32>,
    return
  }
  func.func @transform_0(%arg0: i32) -> (i32, i32, i32) {
    %c0_i32 = arith.constant 0 : i32
    %c0_i32_0 = arith.constant 0 : i32
    %c0_i32_1 = arith.constant 0 : i32
    return %arg0, %c0_i32, %c0_i32_0 : i32, i32, i32
  }
  func.func @transform_1(%arg0: i32) -> (i32, i32) {
    %c0_i32 = arith.constant 0 : i32
    %c0_i32_0 = arith.constant 0 : i32
    %c0_i32_1 = arith.constant 0 : i32
    return %c0_i32, %c0_i32_0 : i32, i32
  }
  func.func @transform_2(%arg0: i32) -> (i32, i32) {
    %c0_i32 = arith.constant 0 : i32
    %c0_i32_0 = arith.constant 0 : i32
    %c0_i32_1 = arith.constant 0 : i32
    return %c0_i32, %c0_i32_0 : i32, i32
  }
  func.func @transform_3(%arg0: i32) -> (i32, i32, i32) {
    %c0_i32 = arith.constant 0 : i32
    %c0_i32_0 = arith.constant 0 : i32
    %c0_i32_1 = arith.constant 0 : i32
    %c0_i32_2 = arith.constant 0 : i32
    return %c0_i32, %c0_i32_0, %c0_i32_1 : i32, i32, i32
  }
  func.func @transform_4(%arg0: i32) -> (i32, i32) {
    %c0_i32 = arith.constant 0 : i32
    %c0_i32_0 = arith.constant 0 : i32
    %c0_i32_1 = arith.constant 0 : i32
    return %c0_i32, %c0_i32_0 : i32, i32
  }
  func.func @transform_5(%arg0: i32) -> (i32, i32, i32) {
    %c0_i32 = arith.constant 0 : i32
    %c0_i32_0 = arith.constant 0 : i32
    %c0_i32_1 = arith.constant 0 : i32
    %c0_i32_2 = arith.constant 0 : i32
    return %c0_i32, %c0_i32_0, %c0_i32_1 : i32, i32, i32
  }
  func.func @transform_6(%arg0: i32) -> (i32, i32) {
    %c0_i32 = arith.constant 0 : i32
    %c0_i32_0 = arith.constant 0 : i32
    %c0_i32_1 = arith.constant 0 : i32
    return %c0_i32, %c0_i32_0 : i32, i32
  }
  func.func @transform_7(%arg0: i32) -> (i32, i32) {
    %c0_i32 = arith.constant 0 : i32
    %c0_i32_0 = arith.constant 0 : i32
    %c0_i32_1 = arith.constant 0 : i32
    return %c0_i32, %c0_i32_0 : i32, i32
  }
  func.func @transform_8(%arg0: i32) -> (i32, i32, i32) {
    %c0_i32 = arith.constant 0 : i32
    %c0_i32_0 = arith.constant 0 : i32
    %c0_i32_1 = arith.constant 0 : i32
    return %arg0, %c0_i32, %c0_i32_0 : i32, i32, i32
  }
}

</mosaic_0001>

<bundles_post_ra>
// kernel: tpu_custom_call.1
= control target key start
LH: loop header
LB: loop body
LE: loop exit
PB: predicated region body
PF: predicated region fallthrough
CT: control target
= control target key end

     0   :  { %13 = vsyncpa [#allocation3], 0  ;;  %s3775_s0 = inlined_call_operand.vmem [shape: f32[2,8,256], index: 0, kind: input, shape index: {}]   ;;  %s3776_s1 = inlined_call_operand.vmem [shape: f32[24,8], index: 1, kind: input, shape index: {}]   ;;  %s3777_s2 = inlined_call_operand.vmem [shape: f32[24,1], index: 2, kind: input, shape index: {}]   ;;  %s3778_s3 = inlined_call_operand.vmem [shape: f32[27,24,1], index: 3, kind: input, shape index: {}]   ;;  %s3779_s4 = inlined_call_operand.vmem [shape: f32[24,1], index: 4, kind: input, shape index: {}]   ;;  %s3780_s5 = inlined_call_operand.vmem [shape: f32[27,1,256], index: 5, kind: input, shape index: {}]   ;;  %s3781_s6 = inlined_call_operand.vmem [shape: f32[8,24], index: 6, kind: input, shape index: {}]   ;;  %s3782_s7 = inlined_call_operand.vmem [shape: f32[8,1], index: 7, kind: input, shape index: {}]   ;;  %s3783_s8 = inlined_call_operand.hbm [shape: f32[2,8,256], index: 8, kind: output, shape index: {}]  }
   0x1   :  { %15 = vsyncpa [#allocation3 + $0x1], 0  ;;  %s2390_s27 = smov 0   ;;  %s2392_s28 = smov 0  }
   0x2   :  { %s2394_s29 = smov 0   ;;  %s2396_s30 = smov 0  }
   0x3 LB: > { %s2411_s9 = sadd.s32 4294967295, %s2325_s30   ;;  %s2077_s10 = sadd.s32 4294967294, %s2325_s30   ;;  %s2325_s30 = sphi %s2396_s30, %s3905_s30   ;;  %s2321_s29 = sphi %s2394_s29, %s3904_s29   ;;  %s2317_s28 = sphi %s2392_s28, %s3903_s28   ;;  %s2313_s27 = sphi %s2390_s27, %s3902_s27  }
   0x4   : > { %s2415_s11 = sadd.s32 1, %s2325_s30   ;;  %s201_s12 = sadd.s32 1, %s2321_s29 }
   0x5   : > { %s198_s13 = ssub.s32 %s2325_s30, %s2415_s11  ;;  %p211_p0 = scmp.ne.s32.totalorder %s2321_s29, %s2317_s28 }
   0x6   : > { %p199_p1 = scmp.eq.s32.totalorder %s198_s13, 0  ;;  %p212_p2 = scmp.eq.s32.totalorder %s2411_s9, 1 }
   0x7   : > { %p217_p3 = scmp.ne.s32.totalorder %s2317_s28, %s2313_s27  ;;  %p218_p4 = scmp.eq.s32.totalorder %s2077_s10, 1 }
   0x8   : > { %s2426_s14 = scalar_select %p199_p1, %s2321_s29, %s201_s12  }
   0x9   : > { %p2428_p5 = por %p212_p2, %p211_p0  ;;  %p2432_p6 = por %p218_p4, %p217_p3 }
   0xa   : > { %p2080_p7 = scmp.ge.s32.totalorder %s2325_s30, 1  ;;  %p265_p8 = scmp.lt.s32.totalorder %s2325_s30, 3 }
   0xc   : > { %p266_p9 = pnand %p2080_p7, %p265_p8 }
   0xe   : > { %269 = sbr.rel (%p266_p9) target bundleno = 870 (0x366), region = 52 }
  0x13   : > { %v309_v0 = vld [vmem:[%s3777_s2] sm:$0xff]  ;;  %p299_p10 = scmp.lt.s32.totalorder %s2411_s9, 1  ;;  %v2327_v1 = vmov 0   ;;  %v311_v2 = vld [vmem:[%s3777_s2 + $0x10] sm:$0xff]  ;;  %vm327_vm0 = vcmask 64512   ;;  %v310_v6 = vld [vmem:[%s3777_s2 + $0x8] sm:$0xff] }
  0x14   : > { %2260 = vset.pattern.permute.xlu0 %v2327_v1  ;;  %2261 = vset.pattern.permute.xlu1 %v2327_v1  ;;  %v306_v3 = vld [vmem:[%s3776_s1] sm:$0xff]  ;;  %v423_v7 = vld [vmem:[%s3778_s3 + $0x8] sm:$0xff]  ;;  %v424_v11 = vld [vmem:[%s3778_s3 + $0x10] sm:$0xff]  ;;  %s2328_s10 = smov 73   ;;  %s2329_s17 = smov 72  }
  0x15   : > { %314 = vperm.xlu0 %2260, %v309_v0   ;;  %s300_s21 = scalar_select %p299_p10, %s2411_s9, 1  ;;  %324 = vperm.xlu1 %2261, %v311_v2   ;;  %v307_v8 = vld [vmem:[%s3776_s1 + $0x8] sm:$0xff]  ;;  %v422_v9 = vld [vmem:[%s3778_s3] sm:$0xff]  ;;  %v308_v12 = vld [vmem:[%s3776_s1 + $0x10] sm:$0xff] }
  0x16   : > { %2262 = vset.pattern.permute.xlu2 %v2327_v1  ;;  %v2091_v10 = vld [vmem:[%s3778_s3 + $0x20] sm:$0xff]  ;;  %v2090_v13 = vld [vmem:[%s3778_s3 + $0x18] sm:$0xff]  ;;  %v2092_v15 = vld [vmem:[%s3778_s3 + $0x28] sm:$0xff]  ;;  %s2330_s18 = smov 71   ;;  %s2331_s19 = smov 65  }
  0x17   : > { %s2201_s22 = sshll.u32 %s300_s21, 4  ;;  %438 = vperm.xlu2 %2262, %v424_v11   ;;  %v2095_v14 = vld [vmem:[%s3778_s3 + $0x38] sm:$0xff]  ;;  %v2094_v16 = vld [vmem:[%s3778_s3 + $0x30] sm:$0xff]  ;;  %v2096_v18 = vld [vmem:[%s3778_s3 + $0x40] sm:$0xff]  ;;  %s2332_s20 = smov 64  }
  0x18   : > { %s303_s25 = scalar_lea.vmem %s3775_s0, %s2201_s22  ;;  %v2099_v17 = vld [vmem:[%s3778_s3 + $0x50] sm:$0xff]  ;;  %v2098_v19 = vld [vmem:[%s3778_s3 + $0x48] sm:$0xff]  ;;  %v2100_v21 = vld [vmem:[%s3778_s3 + $0x58] sm:$0xff]  ;;  %s2333_s21 = smov 63  }
  0x19   : > { %v304_v4 = vld [vmem:[%s303_s25] sm:$0xff]  ;;  %v305_v5 = vld [vmem:[%s303_s25 + $0x8] sm:$0xff]  ;;  %v2104_v23 = vld [vmem:[%s3778_s3 + $0x70] sm:$0xff]  ;;  %s2334_s24 = smov 57   ;;  %s2335_s13 = smov 56  }
  0x1a   : > { %352 = vmatpush.msra.mxu0 %v304_v4  ;;  %378 = vmatpush.msra.mxu1 %v305_v5  ;;  %v2103_v20 = vld [vmem:[%s3778_s3 + $0x68] sm:$0xff]  ;;  %v2102_v22 = vld [vmem:[%s3778_s3 + $0x60] sm:$0xff]  ;;  %v2106_v62 = vld [vmem:[%s3778_s3 + $0x78] sm:$0xff]  ;;  %s2336_s23 = smov 55   ;;  %s2337_s26 = smov 9  }
  0x1b   : > { %2084 = vmatmul.msk.f32.vlgmr.msra.gmra.mxu0 %vm327_vm0, %v306_v3  ;;  %2087 = vmatmul.msk.f32.vlgmr.msra.gmra.mxu1 %vm327_vm0, %v306_v3  ;;  %v2108_v24 = vld [vmem:[%s3778_s3 + $0x88] sm:$0xff]  ;;  %v2107_v40 = vld [vmem:[%s3778_s3 + $0x80] sm:$0xff]  ;;  %s2340_s12 = smov 1   ;;  %s2343_s22 = smov 120  }
  0x1d   : > { %319 = vperm.xlu0 %2260, %v310_v6   ;;  %433 = vperm.xlu1 %2261, %v423_v7  }
  0x1f   : > { %501 = vperm.xlu2 %2262, %v2092_v15  }
  0x23   : > { %2085 = vmatmul.msk.f32.gmra.mxu0 %vm327_vm0, %v307_v8  ;;  %2088 = vmatmul.msk.f32.gmra.mxu1 %vm327_vm0, %v307_v8  ;;  %v2110_v8 = vld [vmem:[%s3778_s3 + $0x90] sm:$0xff] }
  0x25   : > { %428 = vperm.xlu0 %2260, %v422_v9   ;;  %496 = vperm.xlu1 %2261, %v2091_v10  }
  0x27   : > { %564 = vperm.xlu2 %2262, %v2096_v18  }
  0x2b   : > { %2086 = vmatmul.msk.f32.gmra.mxu0 %vm327_vm0, %v308_v12  ;;  %2089 = vmatmul.msk.f32.gmra.mxu1 %vm327_vm0, %v308_v12  ;;  %v2111_v12 = vld [vmem:[%s3778_s3 + $0x98] sm:$0xff] }
  0x2d   : > { %491 = vperm.xlu0 %2260, %v2090_v13   ;;  %559 = vperm.xlu1 %2261, %v2095_v14  }
  0x2f   : > { %627 = vperm.xlu2 %2262, %v2100_v21  }
  0x35   : > { %554 = vperm.xlu0 %2260, %v2094_v16   ;;  %622 = vperm.xlu1 %2261, %v2099_v17   ;;  %v2112_v16 = vld [vmem:[%s3778_s3 + $0xa0] sm:$0xff] }
  0x37   : > { %690 = vperm.xlu2 %2262, %v2104_v23  }
  0x3d   : > { %617 = vperm.xlu0 %2260, %v2098_v19   ;;  %685 = vperm.xlu1 %2261, %v2103_v20   ;;  %v2114_v20 = vld [vmem:[%s3778_s3 + $0xa8] sm:$0xff] }
  0x3f   : > { %753 = vperm.xlu2 %2262, %v2108_v24   ;;  %v2115_v24 = vld [vmem:[%s3778_s3 + $0xb0] sm:$0xff] }
  0x45   : > { %680 = vperm.xlu0 %2260, %v2102_v22  }
  0x71   : > { %v2543_v53 = vpop.permute.xlu2 %438 }
  0x79   : > { %v2551_v54 = vpop.permute.xlu2 %501 }
  0x81   : > { %v2556_v55 = vpop.permute.xlu2 %564 }
  0x87   : > { %v315_v25 = vpop.permute.xlu0 %314  ;;  %v325_v42 = vpop.permute.xlu1 %324 }
  0x89   : > { %v2565_v58 = vpop.permute.xlu2 %627 }
  0x8f   : > { %v320_v34 = vpop.permute.xlu0 %319  ;;  %v2563_v57 = vpop.permute.xlu1 %433 }
  0x91   : > { %v2574_v61 = vpop.permute.xlu2 %690 }
  0x97   : > { %v2561_v56 = vpop.permute.xlu0 %428  ;;  %v2572_v60 = vpop.permute.xlu1 %496 }
  0x98   : > { %v354_v26 = vpop.f32.mrf.mxu0  ;;  %v380_v27 = vpop.f32.mrf.mxu1 }
  0x99   : > { %v355_v28 = vadd.f32 %v354_v26, %v315_v25  ;;  %v381_v29 = vadd.f32 %v380_v27, %v315_v25  ;;  %v2588_v1 = vpop.permute.xlu2 %753 }
  0x9a   : > { %3828 = vst [vmem:[#allocation7_spill] sm:$0xff] %v2588_v1 }
  0x9b   : > { %v389_v30 = vmax.f32 %v355_v28, 0.0  ;;  %v390_v31 = vmax.f32 %v381_v29, 0.0  ;;  %v2116_v28 = vld [vmem:[%s3778_s3 + $0xb8] sm:$0xff] }
  0x9d   : > { %v2515_v32 = vmin.f32 %v389_v30, 6.0  ;;  %v2517_v33 = vmin.f32 %v390_v31, 6.0 }
  0x9f   : > { %3826 = vst [vmem:[#allocation5_spill] sm:$0xff] %v2515_v32  ;;  %407 = vrot.lane.b32.xlu0 %v2517_v33, %s2328_s10  ;;  %401 = vrot.lane.b32.xlu1 %v2515_v32, %s2328_s10  ;;  %v2570_v59 = vpop.permute.xlu0 %491  ;;  %v2584_v0 = vpop.permute.xlu1 %559 }
  0xa0   : > { %v357_v35 = vpop.f32.mrf.mxu0  ;;  %v383_v36 = vpop.f32.mrf.mxu1 }
  0xa1   : > { %v358_v37 = vadd.f32 %v357_v35, %v320_v34  ;;  %v384_v41 = vadd.f32 %v383_v36, %v320_v34  ;;  %v2118_v34 = vld [vmem:[%s3778_s3 + $0xc0] sm:$0xff]  ;;  %v413_v35 = vlaneseq }
  0xa3   : > { %v391_v38 = vmax.f32 %v358_v37, 0.0  ;;  %v392_v46 = vmax.f32 %v384_v41, 0.0 }
  0xa5   : > { %v2521_v39 = vmin.f32 %v391_v38, 6.0  ;;  %v2530_v50 = vmin.f32 %v392_v46, 6.0  ;;  %v425_v38 = vld [vmem:[%s3780_s5] sm:$0x3] }
  0xa6   : > { %v443_v46 = vperm.slane %v425_v38, 1 }
  0xa7   : > { %403 = vrot.lane.b32.xlu2 %v2521_v39, %s2328_s10  ;;  %464 = vrot.lane.b32.xlu0 %v2515_v32, %s2329_s17  ;;  %v2582_v63 = vpop.permute.xlu0 %554  ;;  %v2594_v3 = vpop.permute.xlu1 %622 }
  0xa8   : > { %748 = vperm.xlu1 %2261, %v2107_v40   ;;  %v360_v43 = vpop.f32.mrf.mxu0  ;;  %v386_v44 = vpop.f32.mrf.mxu1  ;;  %v2681_v40 = vand.u32 127, %v413_v35 }
  0xa9   : > { %v361_v45 = vadd.f32 %v360_v43, %v325_v42  ;;  %v387_v48 = vadd.f32 %v386_v44, %v325_v42  ;;  %v2093_v42 = vld [vmem:[%s3780_s5 + $0x2] sm:$0x3]  ;;  %v2097_v43 = vld [vmem:[%s3780_s5 + $0x4] sm:$0x3]  ;;  %v2101_v44 = vld [vmem:[%s3780_s5 + $0x6] sm:$0x3] }
  0xaa   : > { %vm476_vm1 = vcmp.lt.s32.totalorder %v2681_v40, 72  ;;  %vm415_vm2 = vcmp.lt.s32.totalorder %v2681_v40, 73  ;;  %vm539_vm3 = vcmp.lt.s32.totalorder %v2681_v40, 71  ;;  %vm602_vm4 = vcmp.lt.s32.totalorder %v2681_v40, 65 }
  0xab   : > { %v393_v47 = vmax.f32 %v361_v45, 0.0  ;;  %v394_v51 = vmax.f32 %v387_v48, 0.0  ;;  %v442_v45 = vperm.slane %v425_v38, 0  ;;  %v505_v48 = vperm.slane %v2093_v42, 0 }
  0xac   : > { %vm665_vm5 = vcmp.lt.s32.totalorder %v2681_v40, 64  ;;  %vm728_vm6 = vcmp.lt.s32.totalorder %v2681_v40, 63  ;;  %vm791_vm7 = vcmp.lt.s32.totalorder %v2681_v40, 57  ;;  %vm854_vm8 = vcmp.lt.s32.totalorder %v2681_v40, 56 }
  0xad   : > { %v2528_v49 = vmin.f32 %v393_v47, 6.0  ;;  %v2535_v52 = vmin.f32 %v394_v51, 6.0  ;;  %v2119_v47 = vld [vmem:[%s3778_s3 + $0xc8] sm:$0xff]  ;;  %v506_v51 = vperm.slane %v2093_v42, 1  ;;  %v450_v35 = vmul.f32 %v442_v45, %v2543_v53 }
  0xae   : > { %vm917_vm9 = vcmp.lt.s32.totalorder %v2681_v40, 55  ;;  %vm980_vm10 = vcmp.lt.s32.totalorder %v2681_v40, 9  ;;  %vm1043_vm11 = vcmp.lt.s32.totalorder %v2681_v40, 8  ;;  %vm1106_vm12 = vcmp.lt.s32.totalorder %v2681_v40, 7 }
  0xaf   : > { %405 = vrot.lane.b32.xlu2 %v2528_v49, %s2328_s10  ;;  %470 = vrot.lane.b32.xlu0 %v2517_v33, %s2329_s17  ;;  %3827 = vst [vmem:[#allocation6_spill] sm:$0xff] %v2535_v52  ;;  %v2590_v2 = vpop.permute.xlu0 %617  ;;  %v2606_v7 = vpop.permute.xlu1 %685  ;;  %v514_v38 = vmul.f32 %v506_v51, %v2551_v54  ;;  %vm1169_vm13 = vcmp.lt.s32.totalorder %v2681_v40, 1  ;;  %vm1276_vm14 = vcmp.lt.s32.totalorder %v2681_v40, 127  ;;  %vm1339_vm15 = vcmp.lt.s32.totalorder %v2681_v40, 121 }
  0xb0   : > { %409 = vrot.lane.b32.xlu1 %v2530_v50, %s2328_s10  ;;  %vm1402_vm0 = vcmp.lt.s32.totalorder %v2681_v40, 120 }
  0xb7   : > { %411 = vrot.lane.b32.xlu2 %v2535_v52, %s2328_s10  ;;  %527 = vrot.lane.b32.xlu0 %v2515_v32, %s2330_s18  ;;  %v2602_v5 = vpop.permute.xlu0 %680 }
  0xb8   : > { %466 = vrot.lane.b32.xlu1 %v2521_v39, %s2329_s17 }
  0xbf   : > { %468 = vrot.lane.b32.xlu2 %v2528_v49, %s2329_s17  ;;  %533 = vrot.lane.b32.xlu0 %v2517_v33, %s2330_s18 }
  0xc0   : > { %472 = vrot.lane.b32.xlu1 %v2530_v50, %s2329_s17 }
  0xc7   : > { %474 = vrot.lane.b32.xlu2 %v2535_v52, %s2329_s17  ;;  %590 = vrot.lane.b32.xlu0 %v2515_v32, %s2331_s19  ;;  %s2341_s17 = smov 127  }
  0xc8   : > { %529 = vrot.lane.b32.xlu1 %v2521_v39, %s2330_s18 }
  0xcf   : > { %531 = vrot.lane.b32.xlu2 %v2528_v49, %s2330_s18  ;;  %596 = vrot.lane.b32.xlu0 %v2517_v33, %s2331_s19 }
  0xd0   : > { %535 = vrot.lane.b32.xlu1 %v2530_v50, %s2330_s18 }
  0xd7   : > { %537 = vrot.lane.b32.xlu2 %v2535_v52, %s2330_s18  ;;  %653 = vrot.lane.b32.xlu0 %v2515_v32, %s2332_s20  ;;  %s2344_s18 = smov 119  }
  0xd8   : > { %592 = vrot.lane.b32.xlu1 %v2521_v39, %s2331_s19 }
  0xdf   : > { %594 = vrot.lane.b32.xlu2 %v2528_v49, %s2331_s19  ;;  %659 = vrot.lane.b32.xlu0 %v2517_v33, %s2332_s20 }
  0xe0   : > { %598 = vrot.lane.b32.xlu1 %v2530_v50, %s2331_s19 }
  0xe7   : > { %600 = vrot.lane.b32.xlu2 %v2535_v52, %s2331_s19  ;;  %716 = vrot.lane.b32.xlu0 %v2515_v32, %s2333_s21  ;;  %s2339_s19 = smov 7  }
  0xe8   : > { %655 = vrot.lane.b32.xlu1 %v2521_v39, %s2332_s20 }
  0xef   : > { %657 = vrot.lane.b32.xlu2 %v2528_v49, %s2332_s20  ;;  %722 = vrot.lane.b32.xlu0 %v2517_v33, %s2333_s21 }
  0xf0   : > { %661 = vrot.lane.b32.xlu1 %v2530_v50, %s2332_s20 }
  0xf7   : > { %663 = vrot.lane.b32.xlu2 %v2535_v52, %s2332_s20  ;;  %743 = vperm.xlu0 %2260, %v2106_v62   ;;  %v2698_v62 = vperm.slane %v2097_v43, 0 }
  0xf8   : > { %718 = vrot.lane.b32.xlu1 %v2521_v39, %s2333_s21 }
  0xff   : > { %720 = vrot.lane.b32.xlu2 %v2528_v49, %s2333_s21  ;;  %779 = vrot.lane.b32.xlu0 %v2515_v32, %s2334_s24 }
 0x100   : > { %724 = vrot.lane.b32.xlu1 %v2530_v50, %s2333_s21 }
 0x101   : > { %v2597_v4 = vpop.permute.xlu2 %403 }
 0x107   : > { %726 = vrot.lane.b32.xlu2 %v2535_v52, %s2333_s21  ;;  %785 = vrot.lane.b32.xlu0 %v2517_v33, %s2334_s24 }
 0x108   : > { %781 = vrot.lane.b32.xlu1 %v2521_v39, %s2334_s24 }
 0x109   : > { %v2604_v6 = vpop.permute.xlu2 %405 }
 0x10f   : > { %783 = vrot.lane.b32.xlu2 %v2528_v49, %s2334_s24  ;;  %806 = vperm.xlu0 %2260, %v2110_v8   ;;  %v2701_v8 = vperm.slane %v2097_v43, 1 }
 0x110   : > { %787 = vrot.lane.b32.xlu1 %v2530_v50, %s2334_s24 }
 0x111   : > { %v2613_v9 = vpop.permute.xlu0 %407  ;;  %v2615_v10 = vpop.permute.xlu2 %411 }
 0x112   : > { %v2617_v11 = vpop.permute.xlu1 %401  ;;  %v2732_v42 = vsel %vm415_vm2, %v2615_v10, %v2604_v6 }
 0x113   : > { %3834 = vst [vmem:[#allocation13_spill] sm:$0xff] %v2732_v42 }
 0x117   : > { %789 = vrot.lane.b32.xlu2 %v2535_v52, %s2334_s24  ;;  %842 = vrot.lane.b32.xlu0 %v2515_v32, %s2335_s13  ;;  %s2338_s24 = smov 8  }
 0x118   : > { %811 = vperm.xlu1 %2261, %v2111_v12   ;;  %v2703_v12 = vperm.slane %v2101_v44, 0 }
 0x119   : > { %v2624_v13 = vpop.permute.xlu2 %468  ;;  %v2626_v14 = vpop.permute.xlu0 %464 }
 0x11a   : > { %v2628_v15 = vpop.permute.xlu1 %748 }
 0x11b   : > { %3829 = vst [vmem:[#allocation8_spill] sm:$0xff] %v2628_v15 }
 0x11f   : > { %816 = vperm.xlu2 %2262, %v2112_v16   ;;  %848 = vrot.lane.b32.xlu0 %v2517_v33, %s2335_s13 }
 0x120   : > { %844 = vrot.lane.b32.xlu1 %v2521_v39, %s2335_s13 }
 0x121   : > { %v475_v17 = vpop.permute.xlu2 %474  ;;  %v2635_v18 = vpop.permute.xlu0 %470 }
 0x122   : > { %v2637_v19 = vpop.permute.xlu1 %409  ;;  %v2708_v16 = vsel %vm476_vm1, %v475_v17, %v2624_v13 }
 0x123   : > { %3832 = vst [vmem:[#allocation11_spill] sm:$0xff] %v2708_v16 }
 0x127   : > { %846 = vrot.lane.b32.xlu2 %v2528_v49, %s2335_s13  ;;  %869 = vperm.xlu0 %2260, %v2114_v20   ;;  %v2716_v20 = vmul.f32 %v442_v45, %v2563_v57 }
 0x128   : > { %850 = vrot.lane.b32.xlu1 %v2530_v50, %s2335_s13 }
 0x129   : > { %v532_v21 = vpop.permute.xlu2 %531  ;;  %v2644_v22 = vpop.permute.xlu0 %527 }
 0x12a   : > { %v2646_v23 = vpop.permute.xlu1 %466 }
 0x12f   : > { %852 = vrot.lane.b32.xlu2 %v2535_v52, %s2335_s13  ;;  %905 = vrot.lane.b32.xlu0 %v2515_v32, %s2336_s23 }
 0x130   : > { %874 = vperm.xlu1 %2261, %v2115_v24   ;;  %v2718_v24 = vperm.slane %v2101_v44, 1 }
 0x131   : > { %v538_v25 = vpop.permute.xlu2 %537  ;;  %v2654_v26 = vpop.permute.xlu0 %533 }
 0x132   : > { %v2656_v27 = vpop.permute.xlu1 %472 }
 0x137   : > { %879 = vperm.xlu2 %2262, %v2116_v28   ;;  %911 = vrot.lane.b32.xlu0 %v2517_v33, %s2336_s23  ;;  %v513_v28 = vmul.f32 %v505_v48, %v2551_v54  ;;  %v2746_v54 = vsel %vm539_vm3, %v532_v21, %v538_v25 }
 0x138   : > { %907 = vrot.lane.b32.xlu1 %v2521_v39, %s2336_s23 }
 0x139   : > { %v595_v29 = vpop.permute.xlu2 %594  ;;  %v2665_v30 = vpop.permute.xlu0 %590 }
 0x13a   : > { %3830 = vst [vmem:[#allocation9_spill] sm:$0xff] %v2665_v30  ;;  %v2667_v31 = vpop.permute.xlu1 %529  ;;  %v451_v30 = vmul.f32 %v443_v46, %v2543_v53 }
 0x13f   : > { %909 = vrot.lane.b32.xlu2 %v2528_v49, %s2336_s23  ;;  %932 = vperm.xlu0 %2260, %v2118_v34   ;;  %v2724_v34 = vsel %vm476_vm1, %v2624_v13, %v475_v17  ;;  %v2741_v13 = vsel %vm415_vm2, %v2604_v6, %v2615_v10  ;;  %v519_v17 = vmul.f32 %v513_v28, %v2708_v16 }
 0x140   : > { %913 = vrot.lane.b32.xlu1 %v2530_v50, %s2336_s23  ;;  %3833 = vst [vmem:[#allocation12_spill] sm:$0xff] %v2724_v34  ;;  %v576_v6 = vmul.f32 %v2698_v62, %v2556_v55  ;;  %v577_v10 = vmul.f32 %v2701_v8, %v2556_v55  ;;  %v520_v28 = vmul.f32 %v514_v38, %v2724_v34 }
 0x141   : > { %v601_v36 = vpop.permute.xlu2 %600  ;;  %v2676_v37 = vpop.permute.xlu0 %596  ;;  %v640_v55 = vmul.f32 %v2718_v24, %v2565_v58  ;;  %v457_v38 = vmul.f32 %v451_v30, %v2741_v13  ;;  %v511_v30 = vmul.f32 %v505_v48, %v2572_v60 }
 0x142   : > { %3831 = vst [vmem:[#allocation10_spill] sm:$0xff] %v2676_v37  ;;  %v2683_v41 = vpop.permute.xlu1 %535  ;;  %v2768_v16 = vsel %vm602_vm4, %v595_v29, %v601_v36  ;;  %v2772_v53 = vsel %vm602_vm4, %v601_v36, %v595_v29  ;;  %v2120_v37 = vld [vmem:[%s3778_s3 + $0xd0] sm:$0xff] }
 0x143   : > { %v526_v36 = vadd.f32 %v520_v28, %v457_v38 }
 0x147   : > { %915 = vrot.lane.b32.xlu2 %v2535_v52, %s2336_s23  ;;  %968 = vrot.lane.b32.xlu0 %v2515_v32, %s2337_s26  ;;  %s2342_s23 = smov 121  }
 0x148   : > { %937 = vperm.xlu1 %2261, %v2119_v47   ;;  %v2750_v47 = vsel %vm539_vm3, %v538_v25, %v532_v21  ;;  %v639_v21 = vmul.f32 %v2703_v12, %v2565_v58  ;;  %v456_v25 = vmul.f32 %v450_v35, %v2732_v42  ;;  %v583_v35 = vmul.f32 %v577_v10, %v2746_v54 }
 0x149   : > { %v658_v43 = vpop.permute.xlu2 %657  ;;  %v2735_v44 = vpop.permute.xlu0 %653  ;;  %v582_v34 = vmul.f32 %v576_v6, %v2750_v47  ;;  %v2783_v42 = vmul.f32 %v443_v46, %v2563_v57  ;;  %v446_v58 = vmul.f32 %v442_v45, %v2561_v56  ;;  %v447_v57 = vmul.f32 %v443_v46, %v2561_v56 }
 0x14a   : > { %3835 = vst [vmem:[#allocation14_spill] sm:$0xff] %v2735_v44  ;;  %v2752_v15 = vpop.permute.xlu1 %592  ;;  %v2105_v44 = vld [vmem:[%s3780_s5 + $0x8] sm:$0x3]  ;;  %v525_v29 = vadd.f32 %v519_v17, %v456_v25  ;;  %v645_v1 = vmul.f32 %v639_v21, %v2772_v53  ;;  %v589_v10 = vadd.f32 %v583_v35, %v526_v36  ;;  %v509_v45 = vmul.f32 %v505_v48, %v2570_v59 }
 0x14b   : > { %3836 = vst [vmem:[#allocation15_spill] sm:$0xff] %v2752_v15  ;;  %v694_v32 = vperm.slane %v2105_v44, 0  ;;  %v2785_v52 = vperm.slane %v2105_v44, 1  ;;  %v646_v15 = vmul.f32 %v640_v55, %v2768_v16  ;;  %v512_v44 = vmul.f32 %v506_v51, %v2572_v60 }
 0x14c   : > { %v588_v6 = vadd.f32 %v582_v34, %v525_v29  ;;  %v510_v56 = vmul.f32 %v506_v51, %v2570_v59  ;;  %v572_v48 = vmul.f32 %v2698_v62, %v2582_v63  ;;  %v573_v59 = vmul.f32 %v2701_v8, %v2582_v63 }
 0x14d   : > { %v702_v17 = vmul.f32 %v694_v32, %v2574_v61  ;;  %v574_v51 = vmul.f32 %v2698_v62, %v2584_v0  ;;  %v638_v35 = vmul.f32 %v2718_v24, %v2594_v3  ;;  %v2836_v63 = vmul.f32 %v2703_v12, %v2590_v2 }
 0x14e   : > { %v651_v55 = vadd.f32 %v645_v1, %v588_v6  ;;  %v2122_v1 = vld [vmem:[%s3778_s3 + $0xd8] sm:$0xff]  ;;  %v2843_v62 = vmul.f32 %v694_v32, %v2606_v7 }
 0x14f   : > { %942 = vperm.xlu2 %2262, %v2120_v37   ;;  %974 = vrot.lane.b32.xlu0 %v2517_v33, %s2337_s26  ;;  %v703_v37 = vmul.f32 %v2785_v52, %v2574_v61  ;;  %v652_v61 = vadd.f32 %v646_v15, %v589_v10  ;;  %v637_v15 = vmul.f32 %v2703_v12, %v2594_v3  ;;  %v2109_v3 = vld [vmem:[%s3780_s5 + $0xa] sm:$0x3] }
 0x150   : > { %970 = vrot.lane.b32.xlu1 %v2521_v39, %s2337_s26  ;;  %v2865_v12 = vsel %vm476_vm1, %v2635_v18, %v2626_v14 }
 0x151   : > { %v664_v28 = vpop.permute.xlu2 %663  ;;  %v2801_v21 = vpop.permute.xlu0 %659  ;;  %3837 = vst [vmem:[#allocation16_spill] sm:$0xff] %v2865_v12  ;;  %v515_v10 = vmul.f32 %v509_v45, %v2865_v12 }
 0x152   : > { %v2807_v60 = vsel %vm665_vm5, %v658_v43, %v664_v28  ;;  %v2811_v46 = vsel %vm665_vm5, %v664_v28, %v658_v43  ;;  %v599_v25 = vpop.permute.xlu1 %598  ;;  %v575_v43 = vmul.f32 %v2701_v8, %v2584_v0  ;;  %v2840_v0 = vmul.f32 %v2718_v24, %v2590_v2 }
 0x153   : > { %v708_v34 = vmul.f32 %v702_v17, %v2811_v46  ;;  %v709_v38 = vmul.f32 %v703_v37, %v2807_v60  ;;  %v2847_v8 = vmul.f32 %v2785_v52, %v2606_v7  ;;  %v2853_v17 = vmul.f32 %v694_v32, %v2602_v5 }
 0x154   : > { %v2859_v2 = vsel %vm415_vm2, %v2613_v9, %v2617_v11  ;;  %v2873_v32 = vsel %vm415_vm2, %v2617_v11, %v2613_v9  ;;  %v2879_v7 = vsel %vm476_vm1, %v2626_v14, %v2635_v18  ;;  %v2885_v24 = vsel %vm476_vm1, %v2646_v23, %v2656_v27 }
 0x155   : > { %v2830_v29 = vadd.f32 %v708_v34, %v651_v55  ;;  %v2832_v36 = vadd.f32 %v709_v38, %v652_v61  ;;  %v2891_v37 = vsel %vm476_vm1, %v2656_v27, %v2646_v23  ;;  %v2895_v9 = vperm.slane %v2109_v3, 0 }
 0x156   : > { %v2897_v11 = vperm.slane %v2109_v3, 1  ;;  %v2903_v14 = vsel %vm415_vm2, %v2597_v4, %v2637_v19  ;;  %v2909_v18 = vsel %vm415_vm2, %v2637_v19, %v2597_v4  ;;  %v452_v6 = vmul.f32 %v446_v58, %v2859_v2 }
 0x157   : > { %972 = vrot.lane.b32.xlu2 %v2528_v49, %s2337_s26  ;;  %995 = vperm.xlu0 %2260, %v2122_v1   ;;  %v2917_v28 = vsel %vm539_vm3, %v2667_v31, %v2683_v41  ;;  %v2923_v55 = vsel %vm539_vm3, %v2683_v41, %v2667_v31  ;;  %v453_v19 = vmul.f32 %v447_v57, %v2873_v32  ;;  %vm1465_vm1 = vcmp.lt.s32.totalorder %v2681_v40, 119 }
 0x158   : > { %976 = vrot.lane.b32.xlu1 %v2530_v50, %s2337_s26  ;;  %3838 = vst [vmem:[#allocation17_spill] sm:$0xff] %v2917_v28  ;;  %v516_v61 = vmul.f32 %v510_v56, %v2879_v7  ;;  %v517_v58 = vmul.f32 %v511_v30, %v2891_v37  ;;  %v518_v45 = vmul.f32 %v512_v44, %v2885_v24  ;;  %v2123_v56 = vld [vmem:[%s3778_s3 + $0xe0] sm:$0xff]  ;;  %vm1955_vm2 = vcmask 195584  }
 0x159   : > { %v721_v23 = vpop.permute.xlu2 %720  ;;  %v717_v27 = vpop.permute.xlu0 %716  ;;  %3839 = vst [vmem:[#allocation18_spill] sm:$0xff] %v2923_v55  ;;  %v454_v34 = vmul.f32 %v2716_v20, %v2909_v18  ;;  %v455_v38 = vmul.f32 %v2783_v42, %v2903_v14  ;;  %v2937_v31 = vsel %vm539_vm3, %v2644_v22, %v2654_v26  ;;  %v2943_v41 = vsel %vm539_vm3, %v2654_v26, %v2644_v22  ;;  %v3840_v20 = vld [vmem:[#allocation15_spill] sm:$0xff] }
 0x15a   : > { %v656_v4 = vpop.permute.xlu1 %655  ;;  %v580_v57 = vmul.f32 %v574_v51, %v2923_v55  ;;  %v581_v30 = vmul.f32 %v575_v43, %v2917_v28  ;;  %v2950_v42 = vsel %vm602_vm4, %v3840_v20, %v599_v25  ;;  %v2955_v44 = vsel %vm602_vm4, %v599_v25, %v3840_v20  ;;  %v3841_v26 = vld [vmem:[#allocation7_spill] sm:$0xff]  ;;  %v3842_v25 = vld [vmem:[#allocation6_spill] sm:$0xff]  ;;  %v3843_v20 = vld [vmem:[#allocation5_spill] sm:$0xff] }
 0x15b   : > { %v699_v22 = vmul.f32 %v2785_v52, %v2602_v5  ;;  %v765_v51 = vmul.f32 %v2895_v9, %v3841_v26  ;;  %v766_v43 = vmul.f32 %v2897_v11, %v3841_v26  ;;  %v521_v1 = vadd.f32 %v515_v10, %v452_v6  ;;  %v3844_v10 = vld [vmem:[#allocation10_spill] sm:$0xff] }
 0x15c   : > { %v522_v3 = vadd.f32 %v516_v61, %v453_v19  ;;  %v523_v55 = vadd.f32 %v517_v58, %v454_v34  ;;  %v524_v28 = vadd.f32 %v518_v45, %v455_v38  ;;  %v578_v52 = vmul.f32 %v572_v48, %v2943_v41  ;;  %v3845_v19 = vld [vmem:[#allocation9_spill] sm:$0xff] }
 0x15d   : > { %v579_v5 = vmul.f32 %v573_v59, %v2937_v31  ;;  %v643_v12 = vmul.f32 %v637_v15, %v2955_v44  ;;  %v644_v6 = vmul.f32 %v638_v35, %v2950_v42  ;;  %v2979_v61 = vsel %vm602_vm4, %v3845_v19, %v3844_v10 }
 0x15e   : > { %v2985_v58 = vsel %vm602_vm4, %v3844_v10, %v3845_v19  ;;  %v586_v48 = vadd.f32 %v580_v57, %v523_v55  ;;  %v587_v45 = vadd.f32 %v581_v30, %v524_v28 }
 0x15f   : > { %978 = vrot.lane.b32.xlu2 %v3842_v25, %s2337_s26  ;;  %1031 = vrot.lane.b32.xlu0 %v3843_v20, %s2338_s24 }
 0x160   : > { %1000 = vperm.xlu1 %2261, %v2123_v56   ;;  %v649_v26 = vadd.f32 %v643_v12, %v586_v48  ;;  %v650_v10 = vadd.f32 %v644_v6, %v587_v45  ;;  %v642_v6 = vmul.f32 %v2840_v0, %v2979_v61 }
 0x161   : > { %v727_v59 = vpop.permute.xlu2 %726  ;;  %v723_v34 = vpop.permute.xlu0 %722 }
 0x162   : > { %v2989_v15 = vsel %vm728_vm6, %v721_v23, %v727_v59  ;;  %v2993_v35 = vsel %vm728_vm6, %v727_v59, %v721_v23  ;;  %v2997_v38 = vsel %vm728_vm6, %v717_v27, %v723_v34  ;;  %v3001_v56 = vsel %vm728_vm6, %v723_v34, %v717_v27  ;;  %v662_v55 = vpop.permute.xlu1 %661 }
 0x163   : > { %3846 = vst [vmem:[#allocation15_spill] sm:$0xff] %v2997_v38  ;;  %v771_v28 = vmul.f32 %v765_v51, %v2993_v35  ;;  %v772_v57 = vmul.f32 %v766_v43, %v2989_v15  ;;  %v3007_v30 = vsel %vm665_vm5, %v656_v4, %v662_v55  ;;  %v3011_v23 = vsel %vm665_vm5, %v662_v55, %v656_v4  ;;  %v2124_v51 = vld [vmem:[%s3778_s3 + $0xe8] sm:$0xff] }
 0x164   : > { %3847 = vst [vmem:[#allocation7_spill] sm:$0xff] %v3001_v56  ;;  %v706_v19 = vmul.f32 %v2843_v62, %v3011_v23  ;;  %v707_v27 = vmul.f32 %v2847_v8, %v3007_v30  ;;  %v3850_v43 = vld [vmem:[#allocation14_spill] sm:$0xff]  ;;  %v641_v4 = vmul.f32 %v2836_v63, %v2985_v58  ;;  %v584_v34 = vadd.f32 %v578_v52, %v521_v1 }
 0x165   : > { %3848 = vst [vmem:[#allocation6_spill] sm:$0xff] %v3007_v30  ;;  %v3024_v59 = vsel %vm665_vm5, %v3850_v43, %v2801_v21  ;;  %v3030_v12 = vsel %vm665_vm5, %v2801_v21, %v3850_v43  ;;  %v777_v62 = vadd.f32 %v771_v28, %v2830_v29  ;;  %v778_v8 = vadd.f32 %v772_v57, %v2832_v36  ;;  %v3853_v43 = vld [vmem:[#allocation8_spill] sm:$0xff] }
 0x166   : > { %3849 = vst [vmem:[#allocation5_spill] sm:$0xff] %v3011_v23  ;;  %v712_v48 = vadd.f32 %v706_v19, %v649_v26  ;;  %v713_v45 = vadd.f32 %v707_v27, %v650_v10  ;;  %v585_v55 = vadd.f32 %v579_v5, %v522_v3  ;;  %v704_v21 = vmul.f32 %v2853_v17, %v3030_v12 }
 0x167   : > { %3851 = vst [vmem:[#allocation10_spill] sm:$0xff] %v3024_v59  ;;  %1005 = vperm.xlu2 %2262, %v2124_v51   ;;  %1037 = vrot.lane.b32.xlu0 %v2517_v33, %s2338_s24  ;;  %v705_v29 = vmul.f32 %v699_v22, %v3024_v59  ;;  %v647_v28 = vadd.f32 %v641_v4, %v584_v34  ;;  %v2126_v22 = vld [vmem:[%s3778_s3 + $0xf0] sm:$0xff] }
 0x168   : > { %3852 = vst [vmem:[#allocation9_spill] sm:$0xff] %v3030_v12  ;;  %1033 = vrot.lane.b32.xlu1 %v2521_v39, %s2338_s24  ;;  %v648_v0 = vadd.f32 %v642_v6, %v585_v55  ;;  %v763_v4 = vmul.f32 %v2895_v9, %v3853_v43  ;;  %v764_v6 = vmul.f32 %v2897_v11, %v3853_v43 }
 0x169   : > { %v784_v36 = vpop.permute.xlu2 %783  ;;  %v744_v63 = vpop.permute.xlu0 %743  ;;  %v710_v19 = vadd.f32 %v704_v21, %v647_v28 }
 0x16a   : > { %v761_v57 = vmul.f32 %v2895_v9, %v744_v63  ;;  %v762_v26 = vmul.f32 %v2897_v11, %v744_v63  ;;  %v719_v10 = vpop.permute.xlu1 %718  ;;  %v711_v1 = vadd.f32 %v705_v29, %v648_v0  ;;  %v2113_v9 = vld [vmem:[%s3780_s5 + $0xc] sm:$0x3] }
 0x16c   : > { %v767_v3 = vmul.f32 %v761_v57, %v3001_v56  ;;  %v768_v17 = vmul.f32 %v762_v26, %v2997_v38  ;;  %v820_v26 = vperm.slane %v2113_v9, 0 }
 0x16e   : > { %v773_v52 = vadd.f32 %v767_v3, %v710_v19  ;;  %v774_v5 = vadd.f32 %v768_v17, %v711_v1  ;;  %v821_v19 = vperm.slane %v2113_v9, 1 }
 0x16f   : > { %1035 = vrot.lane.b32.xlu2 %v2528_v49, %s2338_s24  ;;  %1058 = vperm.xlu0 %2260, %v2126_v22  }
 0x170   : > { %1039 = vrot.lane.b32.xlu1 %v2530_v50, %s2338_s24 }
 0x171   : > { %v790_v27 = vpop.permute.xlu2 %789  ;;  %v780_v51 = vpop.permute.xlu0 %779 }
 0x172   : > { %v3063_v34 = vsel %vm791_vm7, %v784_v36, %v790_v27  ;;  %v3067_v55 = vsel %vm791_vm7, %v790_v27, %v784_v36  ;;  %v725_v21 = vpop.permute.xlu1 %724  ;;  %v2127_v36 = vld [vmem:[%s3778_s3 + $0xf8] sm:$0xff] }
 0x173   : > { %v3071_v29 = vsel %vm728_vm6, %v719_v10, %v725_v21  ;;  %v3075_v63 = vsel %vm728_vm6, %v725_v21, %v719_v10 }
 0x174   : > { %3854 = vst [vmem:[#allocation14_spill] sm:$0xff] %v3071_v29  ;;  %v769_v11 = vmul.f32 %v763_v4, %v3075_v63  ;;  %v770_v28 = vmul.f32 %v764_v6, %v3071_v29  ;;  %v2128_v4 = vld [vmem:[%s3778_s3 + $0x100] sm:$0xff] }
 0x175   : > { %3855 = vst [vmem:[#allocation8_spill] sm:$0xff] %v3075_v63 }
 0x176   : > { %v775_v0 = vadd.f32 %v769_v11, %v712_v48  ;;  %v776_v57 = vadd.f32 %v770_v28, %v713_v45 }
 0x177   : > { %1041 = vrot.lane.b32.xlu2 %v3842_v25, %s2338_s24  ;;  %1094 = vrot.lane.b32.xlu0 %v3843_v20, %s2339_s19 }
 0x178   : > { %1063 = vperm.xlu1 %2261, %v2127_v36  }
 0x179   : > { %v817_v10 = vpop.permute.xlu2 %816  ;;  %v786_v1 = vpop.permute.xlu0 %785 }
 0x17a   : > { %v828_v3 = vmul.f32 %v820_v26, %v817_v10  ;;  %v829_v17 = vmul.f32 %v821_v19, %v817_v10  ;;  %v3091_v22 = vsel %vm791_vm7, %v780_v51, %v786_v1  ;;  %v3095_v48 = vsel %vm791_vm7, %v786_v1, %v780_v51  ;;  %v782_v45 = vpop.permute.xlu1 %781 }
 0x17b   : > { %3856 = vst [vmem:[#allocation19_spill] sm:$0xff] %v3091_v22 }
 0x17c   : > { %3857 = vst [vmem:[#allocation20_spill] sm:$0xff] %v3095_v48  ;;  %v834_v27 = vmul.f32 %v828_v3, %v3067_v55  ;;  %v835_v43 = vmul.f32 %v829_v17, %v3063_v34  ;;  %v2130_v3 = vld [vmem:[%s3778_s3 + $0x108] sm:$0xff] }
 0x17e   : > { %v840_v6 = vadd.f32 %v834_v27, %v777_v62  ;;  %v841_v21 = vadd.f32 %v835_v43, %v778_v8 }
 0x17f   : > { %1068 = vperm.xlu2 %2262, %v2128_v4   ;;  %1100 = vrot.lane.b32.xlu0 %v2517_v33, %s2339_s19 }
 0x180   : > { %1096 = vrot.lane.b32.xlu1 %v2521_v39, %s2339_s19 }
 0x181   : > { %v847_v51 = vpop.permute.xlu2 %846  ;;  %v807_v9 = vpop.permute.xlu0 %806 }
 0x182   : > { %v824_v11 = vmul.f32 %v820_v26, %v807_v9  ;;  %v825_v28 = vmul.f32 %v821_v19, %v807_v9  ;;  %v788_v36 = vpop.permute.xlu1 %787 }
 0x183   : > { %v3108_v10 = vsel %vm791_vm7, %v782_v45, %v788_v36  ;;  %v3112_v62 = vsel %vm791_vm7, %v788_v36, %v782_v45 }
 0x184   : > { %3858 = vst [vmem:[#allocation21_spill] sm:$0xff] %v3108_v10  ;;  %v830_v8 = vmul.f32 %v824_v11, %v3095_v48  ;;  %v831_v1 = vmul.f32 %v825_v28, %v3091_v22  ;;  %v2117_v28 = vld [vmem:[%s3780_s5 + $0xe] sm:$0x3] }
 0x185   : > { %3859 = vst [vmem:[#allocation22_spill] sm:$0xff] %v3112_v62  ;;  %v884_v48 = vperm.slane %v2117_v28, 1 }
 0x186   : > { %v836_v17 = vadd.f32 %v830_v8, %v773_v52  ;;  %v837_v27 = vadd.f32 %v831_v1, %v774_v5  ;;  %v2131_v1 = vld [vmem:[%s3778_s3 + $0x110] sm:$0xff] }
 0x187   : > { %1098 = vrot.lane.b32.xlu2 %v2528_v49, %s2339_s19  ;;  %1121 = vperm.xlu0 %2260, %v2130_v3   ;;  %v883_v3 = vperm.slane %v2117_v28, 0 }
 0x188   : > { %1102 = vrot.lane.b32.xlu1 %v2530_v50, %s2339_s19 }
 0x189   : > { %v853_v45 = vpop.permute.xlu2 %852  ;;  %v843_v43 = vpop.permute.xlu0 %842 }
 0x18a   : > { %v3126_v4 = vsel %vm854_vm8, %v847_v51, %v853_v45  ;;  %v3130_v9 = vsel %vm854_vm8, %v853_v45, %v847_v51  ;;  %v812_v52 = vpop.permute.xlu1 %811 }
 0x18b   : > { %3860 = vst [vmem:[#allocation23_spill] sm:$0xff] %v3126_v4  ;;  %v826_v5 = vmul.f32 %v820_v26, %v812_v52  ;;  %v827_v11 = vmul.f32 %v821_v19, %v812_v52 }
 0x18c   : > { %3861 = vst [vmem:[#allocation24_spill] sm:$0xff] %v3130_v9 }
 0x18d   : > { %v832_v36 = vmul.f32 %v826_v5, %v3112_v62  ;;  %v833_v8 = vmul.f32 %v827_v11, %v3108_v10 }
 0x18f   : > { %v838_v22 = vadd.f32 %v832_v36, %v775_v0  ;;  %v839_v51 = vadd.f32 %v833_v8, %v776_v57  ;;  %1104 = vrot.lane.b32.xlu2 %v3842_v25, %s2339_s19  ;;  %1157 = vrot.lane.b32.xlu0 %v3843_v20, %s2340_s12  ;;  %v2132_v36 = vld [vmem:[%s3778_s3 + $0x118] sm:$0xff]  ;;  %s2202_s19 = sshll.u32 %s2411_s9, 4 }
 0x190   : > { %1126 = vperm.xlu1 %2261, %v2131_v1  }
 0x191   : > { %v880_v26 = vpop.permute.xlu2 %879  ;;  %v849_v19 = vpop.permute.xlu0 %848 }
 0x192   : > { %v891_v45 = vmul.f32 %v883_v3, %v880_v26  ;;  %v892_v52 = vmul.f32 %v884_v48, %v880_v26  ;;  %v3146_v5 = vsel %vm854_vm8, %v843_v43, %v849_v19  ;;  %v3150_v0 = vsel %vm854_vm8, %v849_v19, %v843_v43  ;;  %v845_v57 = vpop.permute.xlu1 %844 }
 0x193   : > { %3862 = vst [vmem:[#allocation25_spill] sm:$0xff] %v3146_v5 }
 0x194   : > { %3863 = vst [vmem:[#allocation26_spill] sm:$0xff] %v3150_v0  ;;  %v897_v11 = vmul.f32 %v891_v45, %v3130_v9  ;;  %v898_v28 = vmul.f32 %v892_v52, %v3126_v4 }
 0x196   : > { %v903_v8 = vadd.f32 %v897_v11, %v840_v6  ;;  %v904_v1 = vadd.f32 %v898_v28, %v841_v21  ;;  %v2134_v28 = vld [vmem:[%s3778_s3 + $0x120] sm:$0xff] }
 0x197   : > { %1131 = vperm.xlu2 %2262, %v2132_v36   ;;  %1163 = vrot.lane.b32.xlu0 %v2517_v33, %s2340_s12 }
 0x198   : > { %1159 = vrot.lane.b32.xlu1 %v2521_v39, %s2340_s12 }
 0x199   : > { %v910_v43 = vpop.permute.xlu2 %909  ;;  %v870_v26 = vpop.permute.xlu0 %869 }
 0x19a   : > { %v887_v19 = vmul.f32 %v883_v3, %v870_v26  ;;  %v888_v62 = vmul.f32 %v884_v48, %v870_v26  ;;  %v851_v45 = vpop.permute.xlu1 %850 }
 0x19b   : > { %v3163_v52 = vsel %vm854_vm8, %v845_v57, %v851_v45  ;;  %v3167_v6 = vsel %vm854_vm8, %v851_v45, %v845_v57 }
 0x19c   : > { %3864 = vst [vmem:[#allocation27_spill] sm:$0xff] %v3163_v52  ;;  %v893_v21 = vmul.f32 %v887_v19, %v3150_v0  ;;  %v894_v11 = vmul.f32 %v888_v62, %v3146_v5 }
 0x19d   : > { %3865 = vst [vmem:[#allocation28_spill] sm:$0xff] %v3167_v6 }
 0x19e   : > { %v899_v36 = vadd.f32 %v893_v21, %v836_v17  ;;  %v900_v10 = vadd.f32 %v894_v11, %v837_v27  ;;  %v2121_v21 = vld [vmem:[%s3780_s5 + $0x10] sm:$0x3]  ;;  %v2138_v11 = vld [vmem:[%s3778_s3 + $0x138] sm:$0xff] }
 0x19f   : > { %1161 = vrot.lane.b32.xlu2 %v2528_v49, %s2340_s12  ;;  %1184 = vperm.xlu0 %2260, %v2134_v28   ;;  %v947_v5 = vperm.slane %v2121_v21, 1 }
 0x1a0   : > { %1165 = vrot.lane.b32.xlu1 %v2530_v50, %s2340_s12 }
 0x1a1   : > { %v916_v57 = vpop.permute.xlu2 %915  ;;  %v906_v26 = vpop.permute.xlu0 %905 }
 0x1a2   : > { %v3181_v62 = vsel %vm917_vm9, %v910_v43, %v916_v57  ;;  %v3185_v19 = vsel %vm917_vm9, %v916_v57, %v910_v43  ;;  %v875_v17 = vpop.permute.xlu1 %874  ;;  %v2135_v43 = vld [vmem:[%s3778_s3 + $0x128] sm:$0xff]  ;;  %v946_v57 = vperm.slane %v2121_v21, 0 }
 0x1a3   : > { %3866 = vst [vmem:[#allocation29_spill] sm:$0xff] %v3181_v62  ;;  %v889_v27 = vmul.f32 %v883_v3, %v875_v17  ;;  %v890_v45 = vmul.f32 %v884_v48, %v875_v17 }
 0x1a4   : > { %3867 = vst [vmem:[#allocation30_spill] sm:$0xff] %v3185_v19 }
 0x1a5   : > { %v895_v28 = vmul.f32 %v889_v27, %v3167_v6  ;;  %v896_v0 = vmul.f32 %v890_v45, %v3163_v52 }
 0x1a7   : > { %v901_v3 = vadd.f32 %v895_v28, %v838_v22  ;;  %v902_v48 = vadd.f32 %v896_v0, %v839_v51  ;;  %1167 = vrot.lane.b32.xlu2 %v3842_v25, %s2340_s12  ;;  %1228 = vperm.xlu0 %2260, %v2138_v11   ;;  %v2136_v0 = vld [vmem:[%s3778_s3 + $0x130] sm:$0xff]  ;;  %v2139_v11 = vld [vmem:[%s3778_s3 + $0x140] sm:$0xff] }
 0x1a8   : > { %1189 = vperm.xlu1 %2261, %v2135_v43  }
 0x1a9   : > { %v943_v17 = vpop.permute.xlu2 %942  ;;  %v912_v63 = vpop.permute.xlu0 %911 }
 0x1aa   : > { %v954_v29 = vmul.f32 %v946_v57, %v943_v17  ;;  %v955_v56 = vmul.f32 %v947_v5, %v943_v17  ;;  %v3202_v27 = vsel %vm917_vm9, %v906_v26, %v912_v63  ;;  %v3206_v45 = vsel %vm917_vm9, %v912_v63, %v906_v26  ;;  %v908_v21 = vpop.permute.xlu1 %907 }
 0x1ab   : > { %3868 = vst [vmem:[#allocation31_spill] sm:$0xff] %v3202_v27 }
 0x1ac   : > { %3869 = vst [vmem:[#allocation32_spill] sm:$0xff] %v3206_v45  ;;  %v960_v22 = vmul.f32 %v954_v29, %v3185_v19  ;;  %v961_v51 = vmul.f32 %v955_v56, %v3181_v62 }
 0x1ae   : > { %v966_v28 = vadd.f32 %v960_v22, %v903_v8  ;;  %v967_v43 = vadd.f32 %v961_v51, %v904_v1  ;;  %v2140_v22 = vld [vmem:[%s3778_s3 + $0x148] sm:$0xff] }
 0x1af   : > { %1194 = vperm.xlu2 %2262, %v2136_v0   ;;  %1264 = vrot.lane.b32.xlu0 %v3843_v20, %s2341_s17 }
 0x1b0   : > { %1233 = vperm.xlu1 %2261, %v2139_v11  }
 0x1b1   : > { %v973_v63 = vpop.permute.xlu2 %972  ;;  %v933_v29 = vpop.permute.xlu0 %932 }
 0x1b2   : > { %v950_v26 = vmul.f32 %v946_v57, %v933_v29  ;;  %v951_v56 = vmul.f32 %v947_v5, %v933_v29  ;;  %v914_v17 = vpop.permute.xlu1 %913 }
 0x1b3   : > { %v3220_v6 = vsel %vm917_vm9, %v908_v21, %v914_v17  ;;  %v3224_v52 = vsel %vm917_vm9, %v914_v17, %v908_v21  ;;  %v2125_v17 = vld [vmem:[%s3780_s5 + $0x12] sm:$0x3] }
 0x1b4   : > { %3870 = vst [vmem:[#allocation33_spill] sm:$0xff] %v3220_v6  ;;  %v956_v8 = vmul.f32 %v950_v26, %v3206_v45  ;;  %v957_v1 = vmul.f32 %v951_v56, %v3202_v27  ;;  %v1009_v45 = vperm.slane %v2125_v17, 0  ;;  %v1010_v27 = vperm.slane %v2125_v17, 1  ;;  %v2143_v17 = vld [vmem:[%s3778_s3 + $0x158] sm:$0xff] }
 0x1b5   : > { %3871 = vst [vmem:[#allocation34_spill] sm:$0xff] %v3224_v52 }
 0x1b6   : > { %v962_v51 = vadd.f32 %v956_v8, %v899_v36  ;;  %v963_v0 = vadd.f32 %v957_v1, %v900_v10  ;;  %v2142_v8 = vld [vmem:[%s3778_s3 + $0x150] sm:$0xff] }
 0x1b7   : > { %1238 = vperm.xlu2 %2262, %v2140_v22   ;;  %1270 = vrot.lane.b32.xlu0 %v2517_v33, %s2341_s17 }
 0x1b8   : > { %1266 = vrot.lane.b32.xlu1 %v2521_v39, %s2341_s17 }
 0x1b9   : > { %v979_v21 = vpop.permute.xlu2 %978  ;;  %v969_v11 = vpop.permute.xlu0 %968 }
 0x1ba   : > { %v983_v29 = vsel %vm980_vm10, %v973_v63, %v979_v21  ;;  %v986_v26 = vsel %vm980_vm10, %v979_v21, %v973_v63  ;;  %v938_v56 = vpop.permute.xlu1 %937 }
 0x1bb   : > { %v952_v36 = vmul.f32 %v946_v57, %v938_v56  ;;  %v953_v10 = vmul.f32 %v947_v5, %v938_v56 }
 0x1bd   : > { %v958_v1 = vmul.f32 %v952_v36, %v3224_v52  ;;  %v959_v22 = vmul.f32 %v953_v10, %v3220_v6 }
 0x1bf   : > { %v964_v38 = vadd.f32 %v958_v1, %v901_v3  ;;  %v965_v19 = vadd.f32 %v959_v22, %v902_v48  ;;  %1268 = vrot.lane.b32.xlu2 %v2528_v49, %s2341_s17  ;;  %1291 = vperm.xlu0 %2260, %v2142_v8  }
 0x1c0   : > { %1272 = vrot.lane.b32.xlu1 %v2530_v50, %s2341_s17 }
 0x1c1   : > { %v1006_v5 = vpop.permute.xlu2 %1005  ;;  %v975_v57 = vpop.permute.xlu0 %974 }
 0x1c2   : > { %v1017_v63 = vmul.f32 %v1009_v45, %v1006_v5  ;;  %v1018_v21 = vmul.f32 %v1010_v27, %v1006_v5  ;;  %v981_v56 = vsel %vm980_vm10, %v969_v11, %v975_v57  ;;  %v984_v36 = vsel %vm980_vm10, %v975_v57, %v969_v11  ;;  %v971_v10 = vpop.permute.xlu1 %970 }
 0x1c4   : > { %v1023_v3 = vmul.f32 %v1017_v63, %v986_v26  ;;  %v1024_v48 = vmul.f32 %v1018_v21, %v983_v29  ;;  %v2144_v21 = vld [vmem:[%s3778_s3 + $0x160] sm:$0xff] }
 0x1c6   : > { %v1029_v8 = vadd.f32 %v1023_v3, %v966_v28  ;;  %v1030_v1 = vadd.f32 %v1024_v48, %v967_v43 }
 0x1c7   : > { %1274 = vrot.lane.b32.xlu2 %v3842_v25, %s2341_s17  ;;  %1327 = vrot.lane.b32.xlu0 %v3843_v20, %s2342_s23  ;;  %s296_s17 = sand.u32 1, %s2317_s28  }
 0x1c8   : > { %1296 = vperm.xlu1 %2261, %v2143_v17  }
 0x1c9   : > { %v1036_v22 = vpop.permute.xlu2 %1035  ;;  %v996_v5 = vpop.permute.xlu0 %995 }
 0x1ca   : > { %v1013_v11 = vmul.f32 %v1009_v45, %v996_v5  ;;  %v1014_v57 = vmul.f32 %v1010_v27, %v996_v5  ;;  %v977_v26 = vpop.permute.xlu1 %976 }
 0x1cb   : > { %v982_v29 = vsel %vm980_vm10, %v971_v10, %v977_v26  ;;  %v985_v28 = vsel %vm980_vm10, %v977_v26, %v971_v10 }
 0x1cc   : > { %v1019_v43 = vmul.f32 %v1013_v11, %v984_v36  ;;  %v1020_v63 = vmul.f32 %v1014_v57, %v981_v56  ;;  %v2129_v11 = vld [vmem:[%s3780_s5 + $0x14] sm:$0x3]  ;;  %v2146_v57 = vld [vmem:[%s3778_s3 + $0x168] sm:$0xff] }
 0x1ce   : > { %v1025_v3 = vadd.f32 %v1019_v43, %v962_v51  ;;  %v1026_v48 = vadd.f32 %v1020_v63, %v963_v0  ;;  %v1072_v63 = vperm.slane %v2129_v11, 0 }
 0x1cf   : > { %1301 = vperm.xlu2 %2262, %v2144_v21   ;;  %1333 = vrot.lane.b32.xlu0 %v2517_v33, %s2342_s23  ;;  %v1073_v21 = vperm.slane %v2129_v11, 1 }
 0x1d0   : > { %1329 = vrot.lane.b32.xlu1 %v2521_v39, %s2342_s23 }
 0x1d1   : > { %v1042_v17 = vpop.permute.xlu2 %1041  ;;  %v1032_v5 = vpop.permute.xlu0 %1031 }
 0x1d2   : > { %v1046_v56 = vsel %vm1043_vm11, %v1036_v22, %v1042_v17  ;;  %v1049_v36 = vsel %vm1043_vm11, %v1042_v17, %v1036_v22  ;;  %v1001_v10 = vpop.permute.xlu1 %1000 }
 0x1d3   : > { %v1015_v51 = vmul.f32 %v1009_v45, %v1001_v10  ;;  %v1016_v0 = vmul.f32 %v1010_v27, %v1001_v10 }
 0x1d5   : > { %v1021_v26 = vmul.f32 %v1015_v51, %v985_v28  ;;  %v1022_v43 = vmul.f32 %v1016_v0, %v982_v29  ;;  %v2147_v51 = vld [vmem:[%s3778_s3 + $0x170] sm:$0xff] }
 0x1d7   : > { %v1027_v52 = vadd.f32 %v1021_v26, %v964_v38  ;;  %v1028_v6 = vadd.f32 %v1022_v43, %v965_v19  ;;  %1331 = vrot.lane.b32.xlu2 %v2528_v49, %s2342_s23  ;;  %1354 = vperm.xlu0 %2260, %v2146_v57  }
 0x1d8   : > { %1335 = vrot.lane.b32.xlu1 %v2530_v50, %s2342_s23 }
 0x1d9   : > { %v1069_v27 = vpop.permute.xlu2 %1068  ;;  %v1038_v45 = vpop.permute.xlu0 %1037 }
 0x1da   : > { %v1080_v22 = vmul.f32 %v1072_v63, %v1069_v27  ;;  %v1081_v17 = vmul.f32 %v1073_v21, %v1069_v27  ;;  %v1044_v10 = vsel %vm1043_vm11, %v1032_v5, %v1038_v45  ;;  %v1047_v29 = vsel %vm1043_vm11, %v1038_v45, %v1032_v5  ;;  %v1034_v28 = vpop.permute.xlu1 %1033  ;;  %v2148_v45 = vld [vmem:[%s3778_s3 + $0x178] sm:$0xff] }
 0x1dc   : > { %v1086_v38 = vmul.f32 %v1080_v22, %v1049_v36  ;;  %v1087_v19 = vmul.f32 %v1081_v17, %v1046_v56 }
 0x1de   : > { %v1092_v0 = vadd.f32 %v1086_v38, %v1029_v8  ;;  %v1093_v11 = vadd.f32 %v1087_v19, %v1030_v1 }
 0x1df   : > { %1337 = vrot.lane.b32.xlu2 %v3842_v25, %s2342_s23  ;;  %1390 = vrot.lane.b32.xlu0 %v3843_v20, %s2343_s22  ;;  %s2002_s23 = scalar_lea.sflag [#allocation3], %s296_s17 }
 0x1e0   : > { %1359 = vperm.xlu1 %2261, %v2147_v51   ;;  %v2133_v51 = vld [vmem:[%s3780_s5 + $0x16] sm:$0x3] }
 0x1e1   : > { %v1099_v57 = vpop.permute.xlu2 %1098  ;;  %v1059_v26 = vpop.permute.xlu0 %1058 }
 0x1e2   : > { %v1076_v5 = vmul.f32 %v1072_v63, %v1059_v26  ;;  %v1077_v43 = vmul.f32 %v1073_v21, %v1059_v26  ;;  %v1040_v36 = vpop.permute.xlu1 %1039  ;;  %v2150_v26 = vld [vmem:[%s3778_s3 + $0x180] sm:$0xff] }
 0x1e3   : > { %v1045_v56 = vsel %vm1043_vm11, %v1034_v28, %v1040_v36  ;;  %v1048_v8 = vsel %vm1043_vm11, %v1040_v36, %v1034_v28  ;;  %v1135_v36 = vperm.slane %v2133_v51, 0 }
 0x1e4   : > { %v1082_v1 = vmul.f32 %v1076_v5, %v1047_v29  ;;  %v1083_v27 = vmul.f32 %v1077_v43, %v1044_v10 }
 0x1e6   : > { %v1088_v22 = vadd.f32 %v1082_v1, %v1025_v3  ;;  %v1089_v17 = vadd.f32 %v1083_v27, %v1026_v48  ;;  %v1136_v1 = vperm.slane %v2133_v51, 1 }
 0x1e7   : > { %1364 = vperm.xlu2 %2262, %v2148_v45   ;;  %1396 = vrot.lane.b32.xlu0 %v2517_v33, %s2343_s22 }
 0x1e8   : > { %1392 = vrot.lane.b32.xlu1 %v2521_v39, %s2343_s22 }
 0x1e9   : > { %v1105_v38 = vpop.permute.xlu2 %1104  ;;  %v1095_v19 = vpop.permute.xlu0 %1094 }
 0x1ea   : > { %v1109_v10 = vsel %vm1106_vm12, %v1099_v57, %v1105_v38  ;;  %v1112_v29 = vsel %vm1106_vm12, %v1105_v38, %v1099_v57  ;;  %v1064_v28 = vpop.permute.xlu1 %1063 }
 0x1eb   : > { %v1078_v3 = vmul.f32 %v1072_v63, %v1064_v28  ;;  %v1079_v48 = vmul.f32 %v1073_v21, %v1064_v28 }
 0x1ed   : > { %v1084_v5 = vmul.f32 %v1078_v3, %v1048_v8  ;;  %v1085_v43 = vmul.f32 %v1079_v48, %v1045_v56  ;;  %v2151_v3 = vld [vmem:[%s3778_s3 + $0x188] sm:$0xff] }
 0x1ef   : > { %v1090_v27 = vadd.f32 %v1084_v5, %v1027_v52  ;;  %v1091_v45 = vadd.f32 %v1085_v43, %v1028_v6  ;;  %1394 = vrot.lane.b32.xlu2 %v2528_v49, %s2343_s22  ;;  %1417 = vperm.xlu0 %2260, %v2150_v26  }
 0x1f0   : > { %1398 = vrot.lane.b32.xlu1 %v2530_v50, %s2343_s22 }
 0x1f1   : > { %v1132_v63 = vpop.permute.xlu2 %1131  ;;  %v1101_v21 = vpop.permute.xlu0 %1100 }
 0x1f2   : > { %v1143_v57 = vmul.f32 %v1135_v36, %v1132_v63  ;;  %v1144_v38 = vmul.f32 %v1136_v1, %v1132_v63  ;;  %v1107_v28 = vsel %vm1106_vm12, %v1095_v19, %v1101_v21  ;;  %v1110_v56 = vsel %vm1106_vm12, %v1101_v21, %v1095_v19  ;;  %v1097_v8 = vpop.permute.xlu1 %1096  ;;  %v2152_v21 = vld [vmem:[%s3778_s3 + $0x190] sm:$0xff] }
 0x1f4   : > { %v1149_v52 = vmul.f32 %v1143_v57, %v1112_v29  ;;  %v1150_v6 = vmul.f32 %v1144_v38, %v1109_v10 }
 0x1f6   : > { %v1155_v48 = vadd.f32 %v1149_v52, %v1092_v0  ;;  %v1156_v51 = vadd.f32 %v1150_v6, %v1093_v11 }
 0x1f7   : > { %1400 = vrot.lane.b32.xlu2 %v3842_v25, %s2343_s22  ;;  %1453 = vrot.lane.b32.xlu0 %v3843_v20, %s2344_s18  ;;  %s2013_s22 = scalar_lea.hbm %s3783_s8, %s2202_s19 }
 0x1f8   : > { %1422 = vperm.xlu1 %2261, %v2151_v3   ;;  %v2137_v3 = vld [vmem:[%s3780_s5 + $0x18] sm:$0x3]  ;;  %s2017_s26 = sshll.u32 %s2013_s22, 4  ;;  %s2018_s26 = int_to_ptr.hbm [resolvable:$true] %s2017_s26 }
 0x1f9   : > { %v1162_v26 = vpop.permute.xlu2 %1161  ;;  %v1122_v5 = vpop.permute.xlu0 %1121  ;;  %s2277_s10 = sshra.s32 %s2018_s26, 4  ;;  %s2278_s10 = int_to_ptr.hbm [resolvable:$true] %s2277_s10 }
 0x1fa   : > { %v1139_v19 = vmul.f32 %v1135_v36, %v1122_v5  ;;  %v1140_v43 = vmul.f32 %v1136_v1, %v1122_v5  ;;  %v1103_v29 = vpop.permute.xlu1 %1102  ;;  %s2279_s9 = scalar_lea.hbm %s2278_s10, 16  ;;  %p2284_p0 = scmp.lt.s32.totalorder %s2278_s10, %s3783_s8 }
 0x1fb   : > { %v1108_v10 = vsel %vm1106_vm12, %v1097_v8, %v1103_v29  ;;  %v1111_v0 = vsel %vm1106_vm12, %v1103_v29, %v1097_v8  ;;  %v1199_v29 = vperm.slane %v2137_v3, 1  ;;  %p2280_p11 = scmp.ne.s32.totalorder %s2278_s10, %s2279_s9 }
 0x1fc   : > { %v1145_v11 = vmul.f32 %v1139_v19, %v1110_v56  ;;  %v1146_v63 = vmul.f32 %v1140_v43, %v1107_v28  ;;  %v1198_v43 = vperm.slane %v2137_v3, 0  ;;  %v2155_v3 = vld [vmem:[%s3778_s3 + $0x1a0] sm:$0xff] }
 0x1fd   : > { %p2281_p12 = pnand %p2280_p11, %p2428_p5 }
 0x1fe   : > { %v1151_v57 = vadd.f32 %v1145_v11, %v1088_v22  ;;  %v1152_v38 = vadd.f32 %v1146_v63, %v1089_v17 }
 0x1ff   : > { %1427 = vperm.xlu2 %2262, %v2152_v21   ;;  %1459 = vrot.lane.b32.xlu0 %v2517_v33, %s2344_s18  ;;  %v2141_v21 = vld [vmem:[%s3780_s5 + $0x1a] sm:$0x3]  ;;  %p2282_p13 = pneg %p2281_p12 }
 0x200   : > { %1455 = vrot.lane.b32.xlu1 %v2521_v39, %s2344_s18 }
 0x201   : > { %v1168_v52 = vpop.permute.xlu2 %1167  ;;  %v1158_v6 = vpop.permute.xlu0 %1157 }
 0x202   : > { %v1172_v28 = vsel %vm1169_vm13, %v1162_v26, %v1168_v52  ;;  %v1175_v56 = vsel %vm1169_vm13, %v1168_v52, %v1162_v26  ;;  %v1127_v8 = vpop.permute.xlu1 %1126 }
 0x203   : > { %v1141_v22 = vmul.f32 %v1135_v36, %v1127_v8  ;;  %v1142_v17 = vmul.f32 %v1136_v1, %v1127_v8 }
 0x205   : > { %v1147_v5 = vmul.f32 %v1141_v22, %v1111_v0  ;;  %v1148_v19 = vmul.f32 %v1142_v17, %v1108_v10  ;;  %v2156_v22 = vld [vmem:[%s3778_s3 + $0x1a8] sm:$0xff]  ;;  %v2154_v17 = vld [vmem:[%s3778_s3 + $0x198] sm:$0xff] }
 0x207   : > { %v3356_v11 = vadd.f32 %v1147_v5, %v1090_v27  ;;  %v3358_v63 = vadd.f32 %v1148_v19, %v1091_v45  ;;  %1457 = vrot.lane.b32.xlu2 %v2528_v49, %s2344_s18  ;;  %1463 = vrot.lane.b32.xlu0 %v3842_v25, %s2344_s18  ;;  %v1242_v19 = vperm.slane %v2141_v21, 0 }
 0x208   : > { %1461 = vrot.lane.b32.xlu1 %v2530_v50, %s2344_s18  ;;  %s2081_s18 = sshll.u32 %s296_s17, 4 }
 0x209   : > { %v1195_v36 = vpop.permute.xlu2 %1194  ;;  %v1164_v1 = vpop.permute.xlu0 %1163  ;;  %s298_s24 = scalar_lea.vmem [#allocation2], %s2081_s18  ;;  %s2283_s18 = scalar_lea.hbm %s3783_s8, 32 }
 0x20a   : > { %v1206_v26 = vmul.f32 %v1198_v43, %v1195_v36  ;;  %v1207_v0 = vmul.f32 %v1199_v29, %v1195_v36  ;;  %v1170_v10 = vsel %vm1169_vm13, %v1158_v6, %v1164_v1  ;;  %v1173_v27 = vsel %vm1169_vm13, %v1164_v1, %v1158_v6  ;;  %v1160_v45 = vpop.permute.xlu1 %1159  ;;  %s2015_s25 = sshll.u32 %s298_s24, 4  ;;  %p2285_p1 = scmp.lt.s32.totalorder %s2283_s18, %s2279_s9  ;;  %s2016_s25 = int_to_ptr.vmem [resolvable:$true] %s2015_s25 }
 0x20b   : > { %v1243_v36 = vperm.slane %v2141_v21, 1 }
 0x20c   : > { %v1212_v52 = vmul.f32 %v1206_v26, %v1175_v56  ;;  %v1213_v8 = vmul.f32 %v1207_v0, %v1172_v28  ;;  %p2286_p2 = por %p2285_p1, %p2284_p0 }
 0x20e   : > { %v1218_v6 = vadd.f32 %v1212_v52, %v1155_v48  ;;  %v1219_v5 = vadd.f32 %v1213_v8, %v1156_v51  ;;  %v2160_v8 = vld [vmem:[%s3778_s3 + $0x1c0] sm:$0xff]  ;;  %p2287_p3 = pnand %p2286_p2, %p2282_p13 }
 0x20f   : > { %1490 = vperm.xlu2 %2262, %v2156_v22   ;;  %1480 = vperm.xlu0 %2260, %v2154_v17   ;;  %v2158_v22 = vld [vmem:[%s3778_s3 + $0x1b0] sm:$0xff]  ;;  %v2159_v17 = vld [vmem:[%s3778_s3 + $0x1b8] sm:$0xff] }
 0x210   : > { %1485 = vperm.xlu1 %2261, %v2155_v3  }
 0x211   : > { %v1239_v28 = vpop.permute.xlu2 %1238  ;;  %v1185_v56 = vpop.permute.xlu0 %1184 }
 0x212   : > { %v1250_v1 = vmul.f32 %v1242_v19, %v1239_v28  ;;  %v1251_v26 = vmul.f32 %v1243_v36, %v1239_v28  ;;  %v1202_v0 = vmul.f32 %v1198_v43, %v1185_v56  ;;  %v1203_v62 = vmul.f32 %v1199_v29, %v1185_v56  ;;  %v1166_v23 = vpop.permute.xlu1 %1165 }
 0x213   : > { %v1171_v30 = vsel %vm1169_vm13, %v1160_v45, %v1166_v23  ;;  %v1174_v12 = vsel %vm1169_vm13, %v1166_v23, %v1160_v45 }
 0x214   : > { %v1256_v48 = vmul.f32 %v1250_v1, %v2528_v49  ;;  %v1257_v51 = vmul.f32 %v1251_v26, %v3842_v25  ;;  %v1208_v21 = vmul.f32 %v1202_v0, %v1173_v27  ;;  %v1209_v52 = vmul.f32 %v1203_v62, %v1170_v10 }
 0x216   : > { %v1262_v3 = vadd.f32 %v1256_v48, %v1218_v6  ;;  %v1263_v23 = vadd.f32 %v1257_v51, %v1219_v5  ;;  %v1214_v45 = vadd.f32 %v1208_v21, %v1151_v57  ;;  %v1215_v49 = vadd.f32 %v1209_v52, %v1152_v38  ;;  %v2164_v6 = vld [vmem:[%s3778_s3 + $0x1d8] sm:$0xff]  ;;  %v2162_v57 = vld [vmem:[%s3778_s3 + $0x1c8] sm:$0xff]  ;;  %v2163_v48 = vld [vmem:[%s3778_s3 + $0x1d0] sm:$0xff] }
 0x217   : > { %1534 = vperm.xlu2 %2262, %v2160_v8   ;;  %1524 = vperm.xlu0 %2260, %v2158_v22  }
 0x218   : > { %1529 = vperm.xlu1 %2261, %v2159_v17   ;;  %v2166_v17 = vld [vmem:[%s3778_s3 + $0x1e0] sm:$0xff] }
 0x219   : > { %v1269_v25 = vpop.permute.xlu2 %1268  ;;  %v1229_v62 = vpop.permute.xlu0 %1228 }
 0x21a   : > { %v1246_v10 = vmul.f32 %v1242_v19, %v1229_v62  ;;  %v1247_v27 = vmul.f32 %v1243_v36, %v1229_v62  ;;  %v1190_v28 = vpop.permute.xlu1 %1189 }
 0x21b   : > { %v1204_v56 = vmul.f32 %v1198_v43, %v1190_v28  ;;  %v1205_v1 = vmul.f32 %v1199_v29, %v1190_v28 }
 0x21c   : > { %v1252_v26 = vmul.f32 %v1246_v10, %v3843_v20  ;;  %v1253_v0 = vmul.f32 %v1247_v27, %v2517_v33 }
 0x21d   : > { %v1210_v38 = vmul.f32 %v1204_v56, %v1174_v12  ;;  %v1211_v5 = vmul.f32 %v1205_v1, %v1171_v30 }
 0x21e   : > { %v1258_v43 = vadd.f32 %v1252_v26, %v1214_v45  ;;  %v1259_v29 = vadd.f32 %v1253_v0, %v1215_v49 }
 0x21f   : > { %v1216_v20 = vadd.f32 %v1210_v38, %v3356_v11  ;;  %v1217_v33 = vadd.f32 %v1211_v5, %v3358_v63  ;;  %1578 = vperm.xlu2 %2262, %v2164_v6   ;;  %1568 = vperm.xlu0 %2260, %v2162_v57   ;;  %v2145_v11 = vld [vmem:[%s3780_s5 + $0x1c] sm:$0x3]  ;;  %v2168_v63 = vld [vmem:[%s3778_s3 + $0x1f0] sm:$0xff]  ;;  %v2172_v57 = vld [vmem:[%s3778_s3 + $0x208] sm:$0xff] }
 0x220   : > { %1573 = vperm.xlu1 %2261, %v2163_v48   ;;  %v2170_v38 = vld [vmem:[%s3778_s3 + $0x1f8] sm:$0xff]  ;;  %v2171_v5 = vld [vmem:[%s3778_s3 + $0x200] sm:$0xff] }
 0x221   : > { %v1275_v51 = vpop.permute.xlu2 %1274  ;;  %v1265_v21 = vpop.permute.xlu0 %1264 }
 0x222   : > { %v1279_v30 = vsel %vm1276_vm14, %v1269_v25, %v1275_v51  ;;  %v1282_v12 = vsel %vm1276_vm14, %v1275_v51, %v1269_v25  ;;  %v1234_v52 = vpop.permute.xlu1 %1233  ;;  %v1306_v25 = vperm.slane %v2145_v11, 1 }
 0x223   : > { %v1248_v8 = vmul.f32 %v1242_v19, %v1234_v52  ;;  %v1249_v22 = vmul.f32 %v1243_v36, %v1234_v52  ;;  %v2167_v19 = vld [vmem:[%s3778_s3 + $0x1e8] sm:$0xff]  ;;  %v1305_v36 = vperm.slane %v2145_v11, 0 }
 0x225   : > { %v1254_v45 = vmul.f32 %v1248_v8, %v2521_v39  ;;  %v1255_v49 = vmul.f32 %v1249_v22, %v2530_v50 }
 0x227   : > { %v1260_v62 = vadd.f32 %v1254_v45, %v1216_v20  ;;  %v1261_v10 = vadd.f32 %v1255_v49, %v1217_v33  ;;  %1622 = vperm.xlu2 %2262, %v2168_v63   ;;  %1612 = vperm.xlu0 %2260, %v2166_v17   ;;  %v2175_v63 = vld [vmem:[%s3778_s3 + $0x218] sm:$0xff] }
 0x228   : > { %1617 = vperm.xlu1 %2261, %v2167_v19  }
 0x229   : > { %v1302_v27 = vpop.permute.xlu2 %1301  ;;  %v1271_v28 = vpop.permute.xlu0 %1270 }
 0x22a   : > { %v1313_v56 = vmul.f32 %v1305_v36, %v1302_v27  ;;  %v1314_v1 = vmul.f32 %v1306_v25, %v1302_v27  ;;  %v1277_v39 = vsel %vm1276_vm14, %v1265_v21, %v1271_v28  ;;  %v1280_v50 = vsel %vm1276_vm14, %v1271_v28, %v1265_v21  ;;  %v1267_v26 = vpop.permute.xlu1 %1266 }
 0x22c   : > { %v1319_v0 = vmul.f32 %v1313_v56, %v1279_v30  ;;  %v1320_v6 = vmul.f32 %v1314_v1, %v1282_v12 }
 0x22e   : > { %v1325_v48 = vadd.f32 %v1319_v0, %v1262_v3  ;;  %v1326_v20 = vadd.f32 %v1320_v6, %v1263_v23  ;;  %v2176_v3 = vld [vmem:[%s3778_s3 + $0x220] sm:$0xff]  ;;  %v2174_v23 = vld [vmem:[%s3778_s3 + $0x210] sm:$0xff] }
 0x22f   : > { %1666 = vperm.xlu2 %2262, %v2172_v57   ;;  %1656 = vperm.xlu0 %2260, %v2170_v38   ;;  %v2179_v6 = vld [vmem:[%s3778_s3 + $0x230] sm:$0xff] }
 0x230   : > { %1661 = vperm.xlu1 %2261, %v2171_v5  }
 0x231   : > { %v1332_v33 = vpop.permute.xlu2 %1331  ;;  %v1292_v51 = vpop.permute.xlu0 %1291 }
 0x232   : > { %v1309_v21 = vmul.f32 %v1305_v36, %v1292_v51  ;;  %v1310_v30 = vmul.f32 %v1306_v25, %v1292_v51  ;;  %v1273_v12 = vpop.permute.xlu1 %1272 }
 0x233   : > { %v1278_v52 = vsel %vm1276_vm14, %v1267_v26, %v1273_v12  ;;  %v1281_v8 = vsel %vm1276_vm14, %v1273_v12, %v1267_v26 }
 0x234   : > { %v1315_v22 = vmul.f32 %v1309_v21, %v1277_v39  ;;  %v1316_v11 = vmul.f32 %v1310_v30, %v1280_v50  ;;  %v2178_v50 = vld [vmem:[%s3778_s3 + $0x228] sm:$0xff] }
 0x236   : > { %v1321_v17 = vadd.f32 %v1315_v22, %v1258_v43  ;;  %v1322_v45 = vadd.f32 %v1316_v11, %v1259_v29  ;;  %v2149_v43 = vld [vmem:[%s3780_s5 + $0x1e] sm:$0x3]  ;;  %v2183_v11 = vld [vmem:[%s3778_s3 + $0x248] sm:$0xff] }
 0x237   : > { %1710 = vperm.xlu2 %2262, %v2176_v3   ;;  %1700 = vperm.xlu0 %2260, %v2174_v23   ;;  %v2180_v29 = vld [vmem:[%s3778_s3 + $0x238] sm:$0xff] }
 0x238   : > { %1705 = vperm.xlu1 %2261, %v2175_v63  }
 0x239   : > { %v1338_v49 = vpop.permute.xlu2 %1337  ;;  %v1328_v19 = vpop.permute.xlu0 %1327 }
 0x23a   : > { %v1342_v27 = vsel %vm1339_vm15, %v1332_v33, %v1338_v49  ;;  %v1345_v28 = vsel %vm1339_vm15, %v1338_v49, %v1332_v33  ;;  %v1297_v56 = vpop.permute.xlu1 %1296 }
 0x23b   : > { %v1311_v1 = vmul.f32 %v1305_v36, %v1297_v56  ;;  %v1312_v39 = vmul.f32 %v1306_v25, %v1297_v56  ;;  %v1368_v36 = vperm.slane %v2149_v43, 0  ;;  %v1369_v25 = vperm.slane %v2149_v43, 1 }
 0x23d   : > { %v1317_v26 = vmul.f32 %v1311_v1, %v1278_v52  ;;  %v1318_v0 = vmul.f32 %v1312_v39, %v1281_v8 }
 0x23f   : > { %v1323_v57 = vadd.f32 %v1317_v26, %v1260_v62  ;;  %v1324_v38 = vadd.f32 %v1318_v0, %v1261_v10  ;;  %1754 = vperm.xlu2 %2262, %v2180_v29   ;;  %1744 = vperm.xlu0 %2260, %v2178_v50   ;;  %v2184_v62 = vld [vmem:[%s3778_s3 + $0x250] sm:$0xff]  ;;  %v2182_v10 = vld [vmem:[%s3778_s3 + $0x240] sm:$0xff] }
 0x240   : > { %1749 = vperm.xlu1 %2261, %v2179_v6   ;;  %v2187_v29 = vld [vmem:[%s3778_s3 + $0x260] sm:$0xff] }
 0x241   : > { %v1365_v5 = vpop.permute.xlu2 %1364  ;;  %v1334_v33 = vpop.permute.xlu0 %1333 }
 0x242   : > { %v1376_v51 = vmul.f32 %v1368_v36, %v1365_v5  ;;  %v1377_v21 = vmul.f32 %v1369_v25, %v1365_v5  ;;  %v1340_v30 = vsel %vm1339_vm15, %v1328_v19, %v1334_v33  ;;  %v1343_v12 = vsel %vm1339_vm15, %v1334_v33, %v1328_v19  ;;  %v1330_v52 = vpop.permute.xlu1 %1329 }
 0x244   : > { %v1382_v8 = vmul.f32 %v1376_v51, %v1342_v27  ;;  %v1383_v22 = vmul.f32 %v1377_v21, %v1345_v28 }
 0x246   : > { %v1388_v3 = vadd.f32 %v1382_v8, %v1325_v48  ;;  %v1389_v23 = vadd.f32 %v1383_v22, %v1326_v20  ;;  %v2188_v48 = vld [vmem:[%s3778_s3 + $0x268] sm:$0xff]  ;;  %v2186_v20 = vld [vmem:[%s3778_s3 + $0x258] sm:$0xff] }
 0x247   : > { %1798 = vperm.xlu2 %2262, %v2184_v62   ;;  %1788 = vperm.xlu0 %2260, %v2182_v10   ;;  %v2191_v22 = vld [vmem:[%s3778_s3 + $0x278] sm:$0xff] }
 0x248   : > { %1793 = vperm.xlu1 %2261, %v2183_v11  }
 0x249   : > { %v1395_v63 = vpop.permute.xlu2 %1394  ;;  %v1355_v49 = vpop.permute.xlu0 %1354 }
 0x24a   : > { %v1372_v19 = vmul.f32 %v1368_v36, %v1355_v49  ;;  %v1373_v27 = vmul.f32 %v1369_v25, %v1355_v49  ;;  %v1336_v28 = vpop.permute.xlu1 %1335 }
 0x24b   : > { %v1341_v56 = vsel %vm1339_vm15, %v1330_v52, %v1336_v28  ;;  %v1344_v1 = vsel %vm1339_vm15, %v1336_v28, %v1330_v52 }
 0x24c   : > { %v1378_v39 = vmul.f32 %v1372_v19, %v1340_v30  ;;  %v1379_v43 = vmul.f32 %v1373_v27, %v1343_v12  ;;  %v1914_v12 = vld [vmem:[%s3779_s4 + $0x10] sm:$0xff] }
 0x24e   : > { %v1384_v50 = vadd.f32 %v1378_v39, %v1321_v17  ;;  %v1385_v26 = vadd.f32 %v1379_v43, %v1322_v45  ;;  %v2153_v17 = vld [vmem:[%s3780_s5 + $0x20] sm:$0x3]  ;;  %v1913_v43 = vld [vmem:[%s3779_s4 + $0x8] sm:$0xff] }
 0x24f   : > { %1842 = vperm.xlu2 %2262, %v2188_v48   ;;  %1832 = vperm.xlu0 %2260, %v2186_v20   ;;  %v2192_v45 = vld [vmem:[%s3778_s3 + $0x280] sm:$0xff] }
 0x250   : > { %1837 = vperm.xlu1 %2261, %v2187_v29  }
 0x251   : > { %v1401_v0 = vpop.permute.xlu2 %1400  ;;  %v1391_v6 = vpop.permute.xlu0 %1390 }
 0x252   : > { %v1405_v5 = vsel %vm1402_vm0, %v1395_v63, %v1401_v0  ;;  %v1408_v33 = vsel %vm1402_vm0, %v1401_v0, %v1395_v63  ;;  %v1360_v51 = vpop.permute.xlu1 %1359 }
 0x253   : > { %v1374_v21 = vmul.f32 %v1368_v36, %v1360_v51  ;;  %v1375_v30 = vmul.f32 %v1369_v25, %v1360_v51  ;;  %v1431_v36 = vperm.slane %v2153_v17, 0  ;;  %v1432_v25 = vperm.slane %v2153_v17, 1 }
 0x255   : > { %v1380_v52 = vmul.f32 %v1374_v21, %v1341_v56  ;;  %v1381_v8 = vmul.f32 %v1375_v30, %v1344_v1 }
 0x257   : > { %v1386_v62 = vadd.f32 %v1380_v52, %v1323_v57  ;;  %v1387_v10 = vadd.f32 %v1381_v8, %v1324_v38  ;;  %1886 = vperm.xlu2 %2262, %v2192_v45   ;;  %1927 = vperm.xlu0 %2260, %v1914_v12   ;;  %v2190_v57 = vld [vmem:[%s3778_s3 + $0x270] sm:$0xff]  ;;  %v1949_v38 = vld [vmem:[%s3782_s7] sm:$0xff] }
 0x258   : > { %1881 = vperm.xlu1 %2261, %v2191_v22  }
 0x259   : > { %v1428_v11 = vpop.permute.xlu2 %1427  ;;  %v1397_v63 = vpop.permute.xlu0 %1396 }
 0x25a   : > { %v1439_v49 = vmul.f32 %v1431_v36, %v1428_v11  ;;  %v1440_v19 = vmul.f32 %v1432_v25, %v1428_v11  ;;  %v1403_v27 = vsel %vm1402_vm0, %v1391_v6, %v1397_v63  ;;  %v1406_v28 = vsel %vm1402_vm0, %v1397_v63, %v1391_v6  ;;  %v1393_v56 = vpop.permute.xlu1 %1392 }
 0x25c   : > { %v1445_v1 = vmul.f32 %v1439_v49, %v1405_v5  ;;  %v1446_v39 = vmul.f32 %v1440_v19, %v1408_v33 }
 0x25e   : > { %v1451_v48 = vadd.f32 %v1445_v1, %v1388_v3  ;;  %v1452_v20 = vadd.f32 %v1446_v39, %v1389_v23  ;;  %v1912_v3 = vld [vmem:[%s3779_s4] sm:$0xff] }
 0x25f   : > { %1876 = vperm.xlu2 %2262, %v2190_v57   ;;  %1952 = vperm.xlu0 %2260, %v1949_v38  }
 0x260   : > { %1922 = vperm.xlu1 %2261, %v1913_v43  }
 0x261   : > { %v1458_v29 = vpop.permute.xlu2 %1457  ;;  %v1418_v0 = vpop.permute.xlu0 %1417 }
 0x262   : > { %v1435_v6 = vmul.f32 %v1431_v36, %v1418_v0  ;;  %v1436_v5 = vmul.f32 %v1432_v25, %v1418_v0  ;;  %v1399_v33 = vpop.permute.xlu1 %1398 }
 0x263   : > { %v1404_v51 = vsel %vm1402_vm0, %v1393_v56, %v1399_v33  ;;  %v1407_v21 = vsel %vm1402_vm0, %v1399_v33, %v1393_v56 }
 0x264   : > { %v1441_v30 = vmul.f32 %v1435_v6, %v1403_v27  ;;  %v1442_v17 = vmul.f32 %v1436_v5, %v1406_v28 }
 0x266   : > { %v3535_v23 = vadd.f32 %v1441_v30, %v1384_v50  ;;  %v3537_v45 = vadd.f32 %v1442_v17, %v1385_v26  ;;  %v2165_v17 = vld [vmem:[%s3780_s5 + $0x26] sm:$0x3] }
 0x267   : > { %1917 = vperm.xlu2 %2262, %v1912_v3   ;;  %v3572_v40 = vperm.slane %v2165_v17, 1 }
 0x269   : > { %v1491_v12 = vpop.permute.xlu2 %1490  ;;  %v1454_v52 = vpop.permute.xlu0 %1453 }
 0x26a   : > { %v1423_v8 = vpop.permute.xlu1 %1422 }
 0x26b   : > { %v1437_v22 = vmul.f32 %v1431_v36, %v1423_v8  ;;  %v1438_v11 = vmul.f32 %v1432_v25, %v1423_v8  ;;  %v2157_v36 = vld [vmem:[%s3780_s5 + $0x22] sm:$0x3]  ;;  %v2161_v25 = vld [vmem:[%s3780_s5 + $0x24] sm:$0x3] }
 0x26c   : > { %v3550_v39 = vperm.slane %v2161_v25, 0  ;;  %v3552_v57 = vperm.slane %v2161_v25, 1 }
 0x26d   : > { %v1443_v63 = vmul.f32 %v1437_v22, %v1404_v51  ;;  %v1444_v49 = vmul.f32 %v1438_v11, %v1407_v21  ;;  %v3570_v11 = vperm.slane %v2165_v17, 0 }
 0x26f   : > { %v1449_v19 = vadd.f32 %v1443_v63, %v1386_v62  ;;  %v1450_v56 = vadd.f32 %v1444_v49, %v1387_v10  ;;  %v1494_v62 = vperm.slane %v2157_v36, 0  ;;  %v1495_v10 = vperm.slane %v2157_v36, 1 }
 0x271   : > { %v1535_v27 = vpop.permute.xlu2 %1534  ;;  %v1460_v28 = vpop.permute.xlu0 %1459  ;;  %v1502_v21 = vmul.f32 %v1494_v62, %v1491_v12  ;;  %v1503_v30 = vmul.f32 %v1495_v10, %v1491_v12 }
 0x272   : > { %v1466_v50 = vsel %vm1465_vm1, %v1454_v52, %v1460_v28  ;;  %v1469_v26 = vsel %vm1465_vm1, %v1460_v28, %v1454_v52  ;;  %v1456_v1 = vpop.permute.xlu1 %1455  ;;  %v1546_v3 = vmul.f32 %v3550_v39, %v1535_v27  ;;  %v1547_v52 = vmul.f32 %v3552_v57, %v1535_v27  ;;  %v3872_v28 = vld [vmem:[#allocation13_spill] sm:$0xff] }
 0x274   : > { %v1552_v49 = vmul.f32 %v1546_v3, %v2741_v13 }
 0x279   : > { %v1579_v38 = vpop.permute.xlu2 %1578  ;;  %v1464_v43 = vpop.permute.xlu0 %1463 }
 0x27a   : > { %v1462_v0 = vpop.permute.xlu1 %1461  ;;  %v1468_v6 = vsel %vm1465_vm1, %v1458_v29, %v1464_v43  ;;  %v1471_v5 = vsel %vm1465_vm1, %v1464_v43, %v1458_v29  ;;  %v2169_v29 = vld [vmem:[%s3780_s5 + $0x28] sm:$0x3] }
 0x27b   : > { %v1467_v33 = vsel %vm1465_vm1, %v1456_v1, %v1462_v0  ;;  %v1470_v51 = vsel %vm1465_vm1, %v1462_v0, %v1456_v1  ;;  %v1508_v8 = vmul.f32 %v1502_v21, %v1468_v6  ;;  %v1509_v22 = vmul.f32 %v1503_v30, %v1471_v5  ;;  %v2173_v5 = vld [vmem:[%s3780_s5 + $0x2a] sm:$0x3] }
 0x27c   : > { %v3574_v63 = vperm.slane %v2169_v29, 0  ;;  %v3576_v12 = vperm.slane %v2169_v29, 1  ;;  %v1553_v1 = vmul.f32 %v1547_v52, %v3872_v28  ;;  %v1590_v21 = vmul.f32 %v3570_v11, %v1579_v38 }
 0x27d   : > { %v1514_v25 = vadd.f32 %v1508_v8, %v1451_v48  ;;  %v1515_v43 = vadd.f32 %v1509_v22, %v1452_v20  ;;  %v1591_v30 = vmul.f32 %v3572_v40, %v1579_v38  ;;  %v3587_v22 = vperm.slane %v2173_v5, 0 }
 0x27e   : > { %v3589_v28 = vperm.slane %v2173_v5, 1 }
 0x27f   : > { %v1559_v9 = vadd.f32 %v1553_v1, %v1515_v43 }
 0x281   : > { %v1623_v36 = vpop.permute.xlu2 %1622  ;;  %v1481_v27 = vpop.permute.xlu0 %1480 }
 0x282   : > { %v1498_v0 = vmul.f32 %v1494_v62, %v1481_v27  ;;  %v1499_v59 = vmul.f32 %v1495_v10, %v1481_v27  ;;  %v1486_v6 = vpop.permute.xlu1 %1485  ;;  %v1634_v13 = vmul.f32 %v3574_v63, %v1623_v36  ;;  %v1635_v3 = vmul.f32 %v3576_v12, %v1623_v36 }
 0x283   : > { %v1500_v17 = vmul.f32 %v1494_v62, %v1486_v6  ;;  %v1501_v29 = vmul.f32 %v1495_v10, %v1486_v6  ;;  %v1558_v27 = vadd.f32 %v1552_v49, %v1514_v25 }
 0x284   : > { %v1504_v52 = vmul.f32 %v1498_v0, %v1466_v50  ;;  %v1505_v48 = vmul.f32 %v1499_v59, %v1469_v26  ;;  %v3873_v50 = vld [vmem:[#allocation12_spill] sm:$0xff]  ;;  %v3874_v26 = vld [vmem:[#allocation11_spill] sm:$0xff]  ;;  %v1641_v36 = vmul.f32 %v1635_v3, %v2750_v47 }
 0x285   : > { %v1506_v20 = vmul.f32 %v1500_v17, %v1467_v33  ;;  %v1507_v8 = vmul.f32 %v1501_v29, %v1470_v51  ;;  %v1596_v59 = vmul.f32 %v1590_v21, %v3873_v50  ;;  %v1597_v33 = vmul.f32 %v1591_v30, %v3874_v26 }
 0x286   : > { %v3592_v4 = vadd.f32 %v1504_v52, %v3535_v23  ;;  %v3595_v62 = vadd.f32 %v1505_v48, %v3537_v45  ;;  %v1640_v51 = vmul.f32 %v1634_v13, %v2746_v54  ;;  %v2181_v48 = vld [vmem:[%s3780_s5 + $0x2e] sm:$0x3] }
 0x287   : > { %v3597_v10 = vadd.f32 %v1506_v20, %v1449_v19  ;;  %v3599_v38 = vadd.f32 %v1507_v8, %v1450_v56  ;;  %v1602_v25 = vadd.f32 %v1596_v59, %v1558_v27  ;;  %v1603_v23 = vadd.f32 %v1597_v33, %v1559_v9  ;;  %v2177_v56 = vld [vmem:[%s3780_s5 + $0x2c] sm:$0x3] }
 0x288   : > { %v3612_v30 = vperm.slane %v2177_v56, 0  ;;  %v3614_v9 = vperm.slane %v2177_v56, 1  ;;  %v3623_v27 = vperm.slane %v2181_v48, 0  ;;  %v3625_v50 = vperm.slane %v2181_v48, 1  ;;  %v3875_v48 = vld [vmem:[#allocation16_spill] sm:$0xff] }
 0x289   : > { %v1667_v49 = vpop.permute.xlu2 %1666  ;;  %v1525_v1 = vpop.permute.xlu0 %1524  ;;  %v1646_v0 = vadd.f32 %v1640_v51, %v1602_v25  ;;  %v1647_v6 = vadd.f32 %v1641_v36, %v1603_v23 }
 0x28a   : > { %v1678_v43 = vmul.f32 %v3587_v22, %v1667_v49  ;;  %v1679_v45 = vmul.f32 %v3589_v28, %v1667_v49  ;;  %v1530_v19 = vpop.permute.xlu1 %1529  ;;  %v1542_v59 = vmul.f32 %v3550_v39, %v1525_v1  ;;  %v1543_v26 = vmul.f32 %v3552_v57, %v1525_v1 }
 0x28b   : > { %v1544_v33 = vmul.f32 %v3550_v39, %v1530_v19  ;;  %v1545_v51 = vmul.f32 %v3552_v57, %v1530_v19 }
 0x28c   : > { %v1684_v5 = vmul.f32 %v1678_v43, %v2768_v16  ;;  %v1685_v54 = vmul.f32 %v1679_v45, %v2772_v53  ;;  %v1548_v1 = vmul.f32 %v1542_v59, %v2873_v32  ;;  %v1549_v39 = vmul.f32 %v1543_v26, %v2859_v2 }
 0x28d   : > { %v1550_v56 = vmul.f32 %v1544_v33, %v2903_v14 }
 0x28e   : > { %v1690_v47 = vadd.f32 %v1684_v5, %v1646_v0  ;;  %v1691_v21 = vadd.f32 %v1685_v54, %v1647_v6  ;;  %v1551_v0 = vmul.f32 %v1545_v51, %v2909_v18  ;;  %v2189_v54 = vld [vmem:[%s3780_s5 + $0x32] sm:$0x3] }
 0x291   : > { %v1711_v17 = vpop.permute.xlu2 %1710  ;;  %v1569_v29 = vpop.permute.xlu0 %1568 }
 0x292   : > { %v1722_v13 = vmul.f32 %v3612_v30, %v1711_v17  ;;  %v1723_v3 = vmul.f32 %v3614_v9, %v1711_v17  ;;  %v1574_v52 = vpop.permute.xlu1 %1573  ;;  %v1586_v32 = vmul.f32 %v3570_v11, %v1569_v29  ;;  %v1587_v2 = vmul.f32 %v3572_v40, %v1569_v29 }
 0x293   : > { %v1588_v49 = vmul.f32 %v3570_v11, %v1574_v52  ;;  %v1589_v25 = vmul.f32 %v3572_v40, %v1574_v52  ;;  %v3661_v52 = vperm.slane %v2189_v54, 1  ;;  %v1556_v11 = vadd.f32 %v1550_v56, %v3597_v10 }
 0x294   : > { %v1728_v16 = vmul.f32 %v1722_v13, %v2807_v60  ;;  %v1729_v53 = vmul.f32 %v1723_v3, %v2811_v46  ;;  %v2185_v60 = vld [vmem:[%s3780_s5 + $0x30] sm:$0x3]  ;;  %v1555_v13 = vadd.f32 %v1549_v39, %v3595_v62  ;;  %v3659_v3 = vperm.slane %v2189_v54, 0 }
 0x295   : > { %v3640_v57 = vperm.slane %v2185_v60, 0  ;;  %v3642_v19 = vperm.slane %v2185_v60, 1  ;;  %v1594_v14 = vmul.f32 %v1588_v49, %v2885_v24  ;;  %v1595_v18 = vmul.f32 %v1589_v25, %v2891_v37 }
 0x296   : > { %v1734_v20 = vadd.f32 %v1728_v16, %v1690_v47  ;;  %v1735_v8 = vadd.f32 %v1729_v53, %v1691_v21  ;;  %v1557_v40 = vadd.f32 %v1551_v0, %v3599_v38  ;;  %v1592_v37 = vmul.f32 %v1586_v32, %v2879_v7  ;;  %v3876_v53 = vld [vmem:[#allocation17_spill] sm:$0xff] }
 0x297   : > { %v1593_v16 = vmul.f32 %v1587_v2, %v3875_v48  ;;  %v1600_v26 = vadd.f32 %v1594_v14, %v1556_v11  ;;  %v3880_v11 = vld [vmem:[#allocation10_spill] sm:$0xff] }
 0x298   : > { %v1601_v33 = vadd.f32 %v1595_v18, %v1557_v40 }
 0x299   : > { %v1755_v36 = vpop.permute.xlu2 %1754  ;;  %v1613_v46 = vpop.permute.xlu0 %1612  ;;  %v1599_v56 = vadd.f32 %v1593_v16, %v1555_v13  ;;  %v3883_v16 = vld [vmem:[#allocation5_spill] sm:$0xff] }
 0x29a   : > { %v1766_v23 = vmul.f32 %v3623_v27, %v1755_v36  ;;  %v1767_v43 = vmul.f32 %v3625_v50, %v1755_v36  ;;  %v1618_v45 = vpop.permute.xlu1 %1617  ;;  %v1630_v29 = vmul.f32 %v3574_v63, %v1613_v46  ;;  %v1631_v24 = vmul.f32 %v3576_v12, %v1613_v46 }
 0x29b   : > { %v1632_v47 = vmul.f32 %v3574_v63, %v1618_v45  ;;  %v1633_v21 = vmul.f32 %v3576_v12, %v1618_v45 }
 0x29c   : > { %v1772_v6 = vmul.f32 %v1766_v23, %v2989_v15  ;;  %v1773_v5 = vmul.f32 %v1767_v43, %v2993_v35  ;;  %v1554_v35 = vadd.f32 %v1548_v1, %v3592_v4  ;;  %v1636_v36 = vmul.f32 %v1630_v29, %v2937_v31  ;;  %v3881_v29 = vld [vmem:[#allocation9_spill] sm:$0xff] }
 0x29d   : > { %v1638_v4 = vmul.f32 %v1632_v47, %v3876_v53  ;;  %v1637_v46 = vmul.f32 %v1631_v24, %v2943_v41 }
 0x29e   : > { %v1778_v17 = vadd.f32 %v1772_v6, %v1734_v20  ;;  %v1779_v15 = vadd.f32 %v1773_v5, %v1735_v8  ;;  %v3877_v20 = vld [vmem:[#allocation18_spill] sm:$0xff]  ;;  %v1598_v39 = vadd.f32 %v1592_v37, %v1554_v35  ;;  %v3879_v35 = vld [vmem:[#allocation24_spill] sm:$0xff] }
 0x29f   : > { %v1639_v62 = vmul.f32 %v1633_v21, %v3877_v20  ;;  %v1644_v23 = vadd.f32 %v1638_v4, %v1600_v26  ;;  %v3882_v37 = vld [vmem:[#allocation6_spill] sm:$0xff] }
 0x2a0   : > { %v1642_v5 = vadd.f32 %v1636_v36, %v1598_v39 }
 0x2a1   : > { %v1799_v8 = vpop.permute.xlu2 %1798  ;;  %v1657_v59 = vpop.permute.xlu0 %1656  ;;  %v1645_v43 = vadd.f32 %v1639_v62, %v1601_v33 }
 0x2a2   : > { %v1810_v10 = vmul.f32 %v3640_v57, %v1799_v8  ;;  %v1811_v38 = vmul.f32 %v3642_v19, %v1799_v8  ;;  %v1662_v51 = vpop.permute.xlu1 %1661  ;;  %v1674_v63 = vmul.f32 %v3587_v22, %v1657_v59  ;;  %v1675_v12 = vmul.f32 %v3589_v28, %v1657_v59 }
 0x2a3   : > { %v1676_v7 = vmul.f32 %v3587_v22, %v1662_v51  ;;  %v1677_v60 = vmul.f32 %v3589_v28, %v1662_v51 }
 0x2a4   : > { %v1816_v49 = vmul.f32 %v1810_v10, %v3063_v34  ;;  %v1817_v25 = vmul.f32 %v1811_v38, %v3067_v55  ;;  %v1680_v28 = vmul.f32 %v1674_v63, %v2979_v61  ;;  %v1681_v31 = vmul.f32 %v1675_v12, %v2985_v58  ;;  %v2193_v61 = vld [vmem:[%s3780_s5 + $0x34] sm:$0x3] }
 0x2a5   : > { %v1682_v45 = vmul.f32 %v1676_v7, %v2950_v42  ;;  %v1683_v1 = vmul.f32 %v1677_v60, %v2955_v44  ;;  %v1643_v34 = vadd.f32 %v1637_v46, %v1599_v56  ;;  %v3700_v4 = vperm.slane %v2193_v61, 0  ;;  %v3884_v46 = vld [vmem:[#allocation29_spill] sm:$0xff]  ;;  %v3888_v56 = vld [vmem:[#allocation14_spill] sm:$0xff] }
 0x2a6   : > { %v1822_v0 = vadd.f32 %v1816_v49, %v1778_v17  ;;  %v1823_v22 = vadd.f32 %v1817_v25, %v1779_v15  ;;  %v1686_v58 = vadd.f32 %v1680_v28, %v1642_v5  ;;  %v3878_v17 = vld [vmem:[#allocation23_spill] sm:$0xff]  ;;  %v3702_v20 = vperm.slane %v2193_v61, 1  ;;  %v3885_v25 = vld [vmem:[#allocation30_spill] sm:$0xff]  ;;  %v3891_v61 = vld [vmem:[#allocation20_spill] sm:$0xff] }
 0x2a7   : > { %v1688_v6 = vadd.f32 %v1682_v45, %v1644_v23  ;;  %v1689_v41 = vadd.f32 %v1683_v1, %v1645_v43  ;;  %v1687_v21 = vadd.f32 %v1681_v31, %v1643_v34  ;;  %v3886_v43 = vld [vmem:[#allocation15_spill] sm:$0xff] }
 0x2a8   : > { %v3887_v1 = vld [vmem:[#allocation7_spill] sm:$0xff] }
 0x2a9   : > { %v1843_v54 = vpop.permute.xlu2 %1842  ;;  %v1701_v55 = vpop.permute.xlu0 %1700 }
 0x2aa   : > { %v1854_v32 = vmul.f32 %v3659_v3, %v1843_v54  ;;  %v1855_v42 = vmul.f32 %v3661_v52, %v1843_v54  ;;  %v1718_v44 = vmul.f32 %v3612_v30, %v1701_v55  ;;  %v1719_v2 = vmul.f32 %v3614_v9, %v1701_v55  ;;  %v1706_v47 = vpop.permute.xlu1 %1705 }
 0x2ab   : > { %v1720_v14 = vmul.f32 %v3612_v30, %v1706_v47  ;;  %v1721_v18 = vmul.f32 %v3614_v9, %v1706_v47 }
 0x2ac   : > { %v1860_v15 = vmul.f32 %v1854_v32, %v3878_v17  ;;  %v1861_v13 = vmul.f32 %v1855_v42, %v3879_v35  ;;  %v1724_v40 = vmul.f32 %v1718_v44, %v3880_v11  ;;  %v1725_v24 = vmul.f32 %v1719_v2, %v3881_v29  ;;  %v3890_v2 = vld [vmem:[#allocation19_spill] sm:$0xff] }
 0x2ad   : > { %v1726_v48 = vmul.f32 %v1720_v14, %v3882_v37  ;;  %v1727_v53 = vmul.f32 %v1721_v18, %v3883_v16  ;;  %v3893_v18 = vld [vmem:[#allocation22_spill] sm:$0xff] }
 0x2ae   : > { %v1730_v62 = vadd.f32 %v1724_v40, %v1686_v58  ;;  %v1731_v30 = vadd.f32 %v1725_v24, %v1687_v21  ;;  %v1866_v8 = vadd.f32 %v1860_v15, %v1822_v0  ;;  %v1867_v9 = vadd.f32 %v1861_v13, %v1823_v22  ;;  %v3889_v22 = vld [vmem:[#allocation8_spill] sm:$0xff]  ;;  %v3892_v21 = vld [vmem:[#allocation21_spill] sm:$0xff] }
 0x2af   : > { %v1732_v59 = vadd.f32 %v1726_v48, %v1688_v6  ;;  %v1733_v26 = vadd.f32 %v1727_v53, %v1689_v41 }
 0x2b1   : > { %v1887_v33 = vpop.permute.xlu2 %1886  ;;  %v1745_v10 = vpop.permute.xlu0 %1744 }
 0x2b2   : > { %v1898_v38 = vmul.f32 %v3700_v4, %v1887_v33  ;;  %v1899_v51 = vmul.f32 %v3702_v20, %v1887_v33  ;;  %v1762_v63 = vmul.f32 %v3623_v27, %v1745_v10  ;;  %v1763_v12 = vmul.f32 %v3625_v50, %v1745_v10  ;;  %v1750_v7 = vpop.permute.xlu1 %1749  ;;  %v3897_v33 = vld [vmem:[#allocation28_spill] sm:$0xff] }
 0x2b3   : > { %v1764_v60 = vmul.f32 %v3623_v27, %v1750_v7  ;;  %v1765_v36 = vmul.f32 %v3625_v50, %v1750_v7 }
 0x2b4   : > { %v1904_v49 = vmul.f32 %v1898_v38, %v3884_v46  ;;  %v1905_v23 = vmul.f32 %v1899_v51, %v3885_v25  ;;  %v1768_v45 = vmul.f32 %v1762_v63, %v3886_v43  ;;  %v1769_v39 = vmul.f32 %v1763_v12, %v3887_v1  ;;  %v3898_v38 = vld [vmem:[#allocation31_spill] sm:$0xff]  ;;  %v3899_v63 = vld [vmem:[#allocation32_spill] sm:$0xff] }
 0x2b5   : > { %v1770_v0 = vmul.f32 %v1764_v60, %v3888_v56  ;;  %v1771_v28 = vmul.f32 %v1765_v36, %v3889_v22 }
 0x2b6   : > { %v1774_v31 = vadd.f32 %v1768_v45, %v1730_v62  ;;  %v1775_v6 = vadd.f32 %v1769_v39, %v1731_v30  ;;  %v1910_v41 = vadd.f32 %v1904_v49, %v1866_v8  ;;  %v1911_v5 = vadd.f32 %v1905_v23, %v1867_v9  ;;  %v3894_v62 = vld [vmem:[#allocation25_spill] sm:$0xff]  ;;  %v3895_v8 = vld [vmem:[#allocation26_spill] sm:$0xff] }
 0x2b7   : > { %v1776_v34 = vadd.f32 %v1770_v0, %v1732_v59  ;;  %v1777_v27 = vadd.f32 %v1771_v28, %v1733_v26  ;;  %v3896_v59 = vld [vmem:[#allocation27_spill] sm:$0xff]  ;;  %v3900_v0 = vld [vmem:[#allocation33_spill] sm:$0xff]  ;;  %v3901_v28 = vld [vmem:[#allocation34_spill] sm:$0xff] }
 0x2b9   : > { %v1789_v54 = vpop.permute.xlu0 %1788  ;;  %v1877_v13 = vpop.permute.xlu2 %1876 }
 0x2ba   : > { %v1806_v50 = vmul.f32 %v3640_v57, %v1789_v54  ;;  %v1807_v55 = vmul.f32 %v3642_v19, %v1789_v54  ;;  %v1794_v32 = vpop.permute.xlu1 %1793  ;;  %v1894_v24 = vmul.f32 %v3700_v4, %v1877_v13 }
 0x2bb   : > { %v1808_v42 = vmul.f32 %v3640_v57, %v1794_v32  ;;  %v1809_v44 = vmul.f32 %v3642_v19, %v1794_v32  ;;  %v1895_v57 = vmul.f32 %v3702_v20, %v1877_v13 }
 0x2bc   : > { %v1812_v47 = vmul.f32 %v1806_v50, %v3890_v2  ;;  %v1813_v58 = vmul.f32 %v1807_v55, %v3891_v61  ;;  %v1900_v51 = vmul.f32 %v1894_v24, %v3898_v38 }
 0x2bd   : > { %v1814_v14 = vmul.f32 %v1808_v42, %v3892_v21  ;;  %v1815_v17 = vmul.f32 %v1809_v44, %v3893_v18  ;;  %v1901_v12 = vmul.f32 %v1895_v57, %v3899_v63 }
 0x2be   : > { %v1818_v15 = vadd.f32 %v1812_v47, %v1774_v31  ;;  %v1819_v35 = vadd.f32 %v1813_v58, %v1775_v6 }
 0x2bf   : > { %v1820_v11 = vadd.f32 %v1814_v14, %v1776_v34  ;;  %v1821_v40 = vadd.f32 %v1815_v17, %v1777_v27  ;;  %v1948_v14 = vld [vmem:[%s3781_s6] sm:$0xff] }
 0x2c1   : > { %v1833_v29 = vpop.permute.xlu0 %1832  ;;  %v1918_v50 = vpop.permute.xlu2 %1917 }
 0x2c2   : > { %v1850_v19 = vmul.f32 %v3659_v3, %v1833_v29  ;;  %v1851_v37 = vmul.f32 %v3661_v52, %v1833_v29  ;;  %v1838_v48 = vpop.permute.xlu1 %1837 }
 0x2c3   : > { %v1852_v16 = vmul.f32 %v3659_v3, %v1838_v48  ;;  %v1853_v53 = vmul.f32 %v3661_v52, %v1838_v48 }
 0x2c4   : > { %v1856_v30 = vmul.f32 %v1850_v19, %v3894_v62  ;;  %v1857_v9 = vmul.f32 %v1851_v37, %v3895_v8 }
 0x2c5   : > { %v1858_v26 = vmul.f32 %v1852_v16, %v3896_v59  ;;  %v1859_v10 = vmul.f32 %v1853_v53, %v3897_v33 }
 0x2c6   : > { %v1862_v7 = vadd.f32 %v1856_v30, %v1818_v15  ;;  %v1863_v60 = vadd.f32 %v1857_v9, %v1819_v35 }
 0x2c7   : > { %v1864_v36 = vadd.f32 %v1858_v26, %v1820_v11  ;;  %v1865_v46 = vadd.f32 %v1859_v10, %v1821_v40 }
 0x2c8   : > { %v1906_v49 = vadd.f32 %v1900_v51, %v1862_v7  ;;  %v1907_v3 = vadd.f32 %v1901_v12, %v1863_v60 }
 0x2c9   : > { %v1928_v25 = vpop.permute.xlu0 %1927 }
 0x2ca   : > { %v1882_v52 = vpop.permute.xlu1 %1881  ;;  %v1934_v23 = vadd.f32 %v1928_v25, %v1910_v41  ;;  %v1935_v43 = vadd.f32 %v1928_v25, %v1911_v5  ;;  %v1930_v55 = vadd.f32 %v1918_v50, %v1906_v49  ;;  %v1931_v41 = vadd.f32 %v1918_v50, %v1907_v3 }
 0x2cb   : > { %v1896_v45 = vmul.f32 %v3700_v4, %v1882_v52  ;;  %v1897_v1 = vmul.f32 %v3702_v20, %v1882_v52 }
 0x2cc   : > { %v1940_v39 = vmax.f32 %v1934_v23, 0.0  ;;  %v1941_v56 = vmax.f32 %v1935_v43, 0.0  ;;  %v1936_v44 = vmax.f32 %v1930_v55, 0.0  ;;  %v1937_v2 = vmax.f32 %v1931_v41, 0.0 }
 0x2cd   : > { %v1902_v22 = vmul.f32 %v1896_v45, %v3900_v0  ;;  %v1903_v31 = vmul.f32 %v1897_v1, %v3901_v28 }
 0x2ce   : > { %v1946_v6 = vmin.f32 %v1940_v39, 6.0  ;;  %v1947_v34 = vmin.f32 %v1941_v56, 6.0  ;;  %v1942_v58 = vmin.f32 %v1936_v44, 6.0  ;;  %v1943_v21 = vmin.f32 %v1937_v2, 6.0 }
 0x2cf   : > { %v1908_v27 = vadd.f32 %v1902_v22, %v1864_v36  ;;  %v1909_v54 = vadd.f32 %v1903_v31, %v1865_v46 }
 0x2d0   : > { %1972 = vmatpush.msra.mxu2 %v1946_v6  ;;  %1992 = vmatpush.msra.mxu3 %v1947_v34 }
 0x2d1   : > { %v1953_v18 = vpop.permute.xlu0 %1952 }
 0x2d2   : > { %v1923_v5 = vpop.permute.xlu1 %1922 }
 0x2d3   : > { %v1932_v32 = vadd.f32 %v1923_v5, %v1908_v27  ;;  %v1933_v4 = vadd.f32 %v1923_v5, %v1909_v54 }
 0x2d5   : > { %v1938_v42 = vmax.f32 %v1932_v32, 0.0  ;;  %v1939_v20 = vmax.f32 %v1933_v4, 0.0 }
 0x2d7   : > { %v1944_v47 = vmin.f32 %v1938_v42, 6.0  ;;  %v1945_v61 = vmin.f32 %v1939_v20, 6.0 }
 0x2d9   : > { %1973 = vmatpush.msra.mxu2 %v1944_v47  ;;  %1993 = vmatpush.msra.mxu3 %v1945_v61 }
 0x2db   : > { %1974 = vmatpush.msra.mxu2 %v1942_v58  ;;  %1994 = vmatpush.msra.mxu3 %v1943_v21 }
 0x2dc   : > { %2194 = vmatmul.msk.f32.vlgmr.msra.gmra.mxu2 %vm1955_vm2, %v1948_v14  ;;  %2195 = vmatmul.msk.f32.vlgmr.msra.gmra.mxu3 %vm1955_vm2, %v1948_v14 }
 0x35f   : > { %v1976_v17 = vpop.f32.mrf.mxu2  ;;  %v1996_v15 = vpop.f32.mrf.mxu3 }
 0x360   : > { %v1977_v35 = vadd.f32 %v1976_v17, %v1953_v18  ;;  %v1997_v13 = vadd.f32 %v1996_v15, %v1953_v18 }
 0x362   : > { %1999 = vst [vmem:[%s298_s24] sm:$0xff] %v1977_v35 }
 0x363   : > { %2000 = vst [vmem:[%s298_s24 + $0x8] sm:$0xff] %v1997_v13 }
 0x364   : > { %2290 = shalt.err (!%p2287_p3)
}
 0x365   : > { %2203 = dma.vmem_to_hbm [thread:$0]  (%p2428_p5), %s2016_s25, 256, %s2018_s26, %s2002_s23  }
 0x366 PF: > { %p2209_p4 = scmp.ge.s32.totalorder %s2325_s30, 2  ;;  %s2029_s17 = sand.u32 1, %s2313_s27  }
 0x367   : > { %s2030_s21 = scalar_lea.sflag [#allocation3], %s2029_s17 }
 0x368   : > { %p2206_p7 = pnand %p2209_p4, %p2432_p6 }
 0x36a   : > { %p2207_p8 = pneg %p2206_p7 }
 0x36c   : > { %2308 = dma.done.wait (%p2207_p8), %s2030_s21, 256  }
 0x36d   : > { %2310 = vsyncadd (%p2207_p8), %s2030_s21, 4294967040  ;;  %p18_p9 = scmp.ge.s32.totalorder %s2415_s11, 4   ;;  %s3902_s27 = smov %s2317_s28 }
 0x36e   : > { %s3903_s28 = smov %s2321_s29  ;;  %s3904_s29 = smov %s2426_s14 }
 0x36f   : > { %s3905_s30 = smov %s2415_s11  ;;  %20 = sbr.rel (!%p18_p9) target bundleno = 3 (0x3), region = 139 }
 0x374   :  { %2036 = vsyncpa [#allocation3], 1 }
 0x375   :  { %2038 = vsyncpa [#allocation3 + $0x1], 1 }

</bundles_post_ra>
